<compile_context>
chip_gen: v7x
topology: tpu7x:2x2x1
jax: 0.10.0
libtpu: 0.0.40
codegen_flags: <defaults>
</compile_context>

<pallas_src>
import functools

import jax
import jax.numpy as jnp
from jax import lax
from jax.experimental import pallas as pl
from jax.experimental.pallas import tpu as pltpu


def _round_up(x, m):
    return ((x + m - 1) // m) * m


def _largest_divisor_tile(m, cap, step=8):
    """Largest multiple of `step` that divides `m` and is <= cap (m % step == 0)."""
    t = min(cap, m)
    t -= t % step
    t = max(t, step)
    while m % t:
        t -= step
    return t


# ----------------------------------------------------------------------------
# Single-pass tiled matmul + bias:  (M, K) @ (K, N) + b -> (M, N).
# K is fully resident (no K grid axis, no accumulator scratch); grid is
# (M//tm, N//tn), both "parallel".  Operands are pre-cast bf16; accumulation
# is f32 on the MXU; bias added once per output tile.
# ----------------------------------------------------------------------------
def _matmul_bias_kernel(x_ref, w_ref, b_ref, o_ref):
    acc = jnp.dot(x_ref[...], w_ref[...], preferred_element_type=jnp.float32)
    o_ref[...] = (acc + b_ref[...]).astype(o_ref.dtype)


def matmul_bias_pallas(x, w, b, *, tm, tn, out_dtype):
    """x:(M,K) bf16, w:(K,N) bf16, b:(1,N) f32 -> (M,N) out_dtype. tm|M, tn|N."""
    M, K = x.shape
    K2, N = w.shape
    assert K == K2 and b.shape == (1, N)
    assert M % tm == 0 and N % tn == 0 and tm % 8 == 0 and tn % 128 == 0

    def est(tm_, tn_):  # double-buffered VMEM estimate
        return 2 * (tm_ * K * x.dtype.itemsize
                    + K * tn_ * w.dtype.itemsize
                    + tn_ * 4
                    + tm_ * tn_ * jnp.dtype(out_dtype).itemsize)

    # VMEM guard (v7x has 64 MiB physical): shrink tiles if the resident
    # configuration would not fit comfortably.
    budget = 40 << 20
    while est(tm, tn) > budget and tn > 128 and N % (tn // 2) == 0 and (tn // 2) % 128 == 0:
        tn //= 2
    while est(tm, tn) > budget and tm > 8 and M % (tm // 2) == 0 and (tm // 2) % 8 == 0:
        tm //= 2
    vmem_limit = min(max(int(est(tm, tn) * 1.5) + (4 << 20), 32 << 20), 48 << 20)

    return pl.pallas_call(
        _matmul_bias_kernel,
        out_shape=jax.ShapeDtypeStruct((M, N), out_dtype),
        grid_spec=pltpu.PrefetchScalarGridSpec(
            num_scalar_prefetch=0,
            grid=(M // tm, N // tn),
            in_specs=[
                pl.BlockSpec((tm, K), lambda i, j: (i, 0)),   # activation
                pl.BlockSpec((K, tn), lambda i, j: (0, j)),   # weight (streamed)
                pl.BlockSpec((1, tn), lambda i, j: (0, j)),   # bias
            ],
            out_specs=pl.BlockSpec((tm, tn), lambda i, j: (i, j)),
        ),
        compiler_params=pltpu.CompilerParams(
            dimension_semantics=("parallel", "parallel"),
            vmem_limit_bytes=vmem_limit),
    )(x, w, b)


# ----------------------------------------------------------------------------
# LSTM recurrence, chunked over time: one grid step processes CHUNK timesteps.
# Per timestep it only does h_prev @ W_hh^T (bf16 operands, f32 accumulate) and
# the f32 gate elementwise math; the input projection + bias arrive precomputed
# (bf16) in gx_ref.  h/c persist in f32 VMEM scratch across grid steps.
# ----------------------------------------------------------------------------
def _lstm_chunk_kernel(gx_ref, whh_ref, h_out_ref, h_ref, c_ref, *, chunk, hp):
    tc = pl.program_id(0)

    @pl.when(tc == 0)
    def _():
        h_ref[...] = jnp.zeros_like(h_ref)
        c_ref[...] = jnp.zeros_like(c_ref)

    h = h_ref[...]                               # (Bp, Hp) f32
    c = c_ref[...]                               # (Bp, Hp) f32
    whh = whh_ref[...]                           # (Hp, 4Hp) bf16, loop-invariant

    for j in range(chunk):                       # static unroll, static slices
        gx = gx_ref[:, j * 4 * hp:(j + 1) * 4 * hp].astype(jnp.float32)
        gates = gx + jnp.dot(h.astype(jnp.bfloat16), whh,
                             preferred_element_type=jnp.float32)   # (Bp, 4Hp)
        # PyTorch gate order: i, f, g, o.  Hp is lane-aligned (multiple of 128).
        i_g = jax.nn.sigmoid(gates[:, 0 * hp:1 * hp])
        f_g = jax.nn.sigmoid(gates[:, 1 * hp:2 * hp])
        g_g = jnp.tanh(gates[:, 2 * hp:3 * hp])
        o_g = jax.nn.sigmoid(gates[:, 3 * hp:4 * hp])
        c = f_g * c + i_g * g_g
        h = o_g * jnp.tanh(c)
        h_out_ref[:, j * hp:(j + 1) * hp] = h.astype(h_out_ref.dtype)

    h_ref[...] = h
    c_ref[...] = c


def lstm_recurrence_pallas(gx2d, w_hh_bf16, T):
    """gx2d: (Bp, T*4Hp) bf16 precomputed gate inputs -> (Bp, T*Hp) bf16 hiddens."""
    Bp = gx2d.shape[0]
    Hp = w_hh_bf16.shape[0]

    chunk = 1
    for c in range(min(8, T), 0, -1):            # largest divisor of T, <= 8
        if T % c == 0:
            chunk = c
            break

    kernel = functools.partial(_lstm_chunk_kernel, chunk=chunk, hp=Hp)
    return pl.pallas_call(
        kernel,
        out_shape=jax.ShapeDtypeStruct((Bp, T * Hp), jnp.bfloat16),
        grid_spec=pltpu.PrefetchScalarGridSpec(
            num_scalar_prefetch=0,
            grid=(T // chunk,),
            in_specs=[
                # per-chunk (Bp, CHUNK*4Hp) slab, batch-first, lane-dense.
                pl.BlockSpec((Bp, chunk * 4 * Hp), lambda tc: (0, tc)),
                # loop-invariant recurrent weight: constant index, fetched once.
                pl.BlockSpec((Hp, 4 * Hp), lambda tc: (0, 0)),
            ],
            out_specs=pl.BlockSpec((Bp, chunk * Hp), lambda tc: (0, tc)),
            scratch_shapes=[
                pltpu.VMEM((Bp, Hp), jnp.float32),   # h state
                pltpu.VMEM((Bp, Hp), jnp.float32),   # c state
            ],
        ),
        # time is a true recurrence -> sequential.
        compiler_params=pltpu.CompilerParams(
            dimension_semantics=("arbitrary",),
            vmem_limit_bytes=32 << 20),
    )(gx2d, w_hh_bf16)


# ----------------------------------------------------------------------------
# Forward pass (mirror of DecoderRNN.forward)
# ----------------------------------------------------------------------------
def decoder_rnn_forward(params, features, captions, vocab_size):
    """features: (B, E) f32, captions: (B, T_cap) i32 -> (B, T_cap, V) f32."""
    B, E = features.shape
    captions = captions[:, :-1]

    emb_p = params["embedding_p"]                 # (V, Ep) f32, pre-padded
    Ep = emb_p.shape[1]
    Hp = params["w_hh_t_p"].shape[0]
    Vp = params["w_fc_t_p"].shape[1]
    Bp = _round_up(B, 8)

    # Embedding gather + concat stay in XLA (tiny gather, no Pallas win).
    embeds = jnp.take(emb_p, captions, axis=0)                        # (B, T-1, Ep)
    feat_p = jnp.pad(features, ((0, 0), (0, Ep - E)))                 # (B, Ep)
    inputs = jnp.concatenate([feat_p[:, None, :], embeds], axis=1)    # (B, T, Ep)
    T = inputs.shape[1]
    inputs = jnp.pad(inputs, ((0, Bp - B), (0, 0), (0, 0))).astype(jnp.bfloat16)

    M = Bp * T
    x2d = inputs.reshape(M, Ep)                                       # free reshape

    # 1) time-parallel input projection (+ combined LSTM bias): K resident,
    #    w_ih fetched once, x streamed over M tiles.  bf16 output slab.
    gx = matmul_bias_pallas(x2d, params["w_ih_t_p"], params["b_comb_p"],
                            tm=_largest_divisor_tile(M, 256), tn=4 * Hp,
                            out_dtype=jnp.bfloat16)                   # (M, 4Hp)

    # 2) sequential recurrence, chunked over time.  (M, 4Hp)->(Bp, T*4Hp) is free.
    h2d = lstm_recurrence_pallas(gx.reshape(Bp, T * 4 * Hp),
                                 params["w_hh_t_p"], T)               # (Bp, T*Hp)

    # 3) time-parallel vocab projection: activation fully resident (when it fits),
    #    w_fc streamed over N tiles exactly once (N axis stays parallel for v7x).
    tn_fc = 512 if Vp % 512 == 0 else (256 if Vp % 256 == 0 else 128)
    tm_fc = M if M * Hp * 2 <= (16 << 20) else _largest_divisor_tile(M, 512)
    logits = matmul_bias_pallas(h2d.reshape(M, Hp), params["w_fc_t_p"],
                                params["b_fc_p"], tm=tm_fc, tn=tn_fc,
                                out_dtype=jnp.float32)                # (M, Vp) f32

    # Rows are already batch-major / time-minor: batch-first output, no transpose.
    # Single slice at the very end.
    return logits.reshape(Bp, T, Vp)[:B, :, :vocab_size]


# ----------------------------------------------------------------------------
# Parameters (raw for the reference; padded + pre-cast bf16 for the kernels)
# ----------------------------------------------------------------------------
def init_params(key, embed_size, hidden_size, vocab_size):
    ks = jax.random.split(key, 7)
    scale = 1.0 / jnp.sqrt(hidden_size)
    return {
        "embedding": jax.random.normal(ks[0], (vocab_size, embed_size), jnp.float32),
        # stored transposed (input @ W); PyTorch gate order i, f, g, o.
        "w_ih_t": jax.random.uniform(ks[1], (embed_size, 4 * hidden_size),
                                     jnp.float32, -scale, scale),
        "w_hh_t": jax.random.uniform(ks[2], (hidden_size, 4 * hidden_size),
                                     jnp.float32, -scale, scale),
        "b_ih": jax.random.uniform(ks[3], (4 * hidden_size,), jnp.float32, -scale, scale),
        "b_hh": jax.random.uniform(ks[4], (4 * hidden_size,), jnp.float32, -scale, scale),
        "w_fc_t": jax.random.uniform(ks[5], (hidden_size, vocab_size),
                                     jnp.float32, -scale, scale),
        "b_fc": jax.random.uniform(ks[6], (vocab_size,), jnp.float32, -scale, scale),
    }


def pad_params(raw, embed_size, hidden_size, vocab_size):
    """One-time: pad E/H/V to lane multiples and cast weights to bf16.  Each of
    the 4 gate blocks is padded separately so gate slices stay at k*Hp:(k+1)*Hp.
    Zero padding keeps the math exact."""
    H = hidden_size
    Ep = _round_up(embed_size, 128)
    Hp = _round_up(H, 128)
    Vp = _round_up(vocab_size, 128)

    def pad_gate_cols(w):                     # (rows, 4H) -> (rows, 4Hp)
        rows = w.shape[0]
        w4 = w.reshape(rows, 4, H)
        w4 = jnp.pad(w4, ((0, 0), (0, 0), (0, Hp - H)))
        return w4.reshape(rows, 4 * Hp)

    w_ih = jnp.pad(pad_gate_cols(raw["w_ih_t"]), ((0, Ep - embed_size), (0, 0)))
    w_hh = jnp.pad(pad_gate_cols(raw["w_hh_t"]), ((0, Hp - H), (0, 0)))
    b_comb = pad_gate_cols((raw["b_ih"] + raw["b_hh"])[None, :])
    w_fc = jnp.pad(raw["w_fc_t"], ((0, Hp - H), (0, Vp - vocab_size)))
    b_fc = jnp.pad(raw["b_fc"], (0, Vp - vocab_size))[None, :]
    emb = jnp.pad(raw["embedding"], ((0, 0), (0, Ep - embed_size)))

    # TODO(synk): on v7x, w_fc could additionally be stored fp8 with per-column
    # scales to halve fc-weight HBM traffic; kept bf16 here for cross-chip safety.
    return {
        "embedding_p": emb,                          # (V, Ep) f32
        "w_ih_t_p": w_ih.astype(jnp.bfloat16),       # (Ep, 4Hp) bf16
        "w_hh_t_p": w_hh.astype(jnp.bfloat16),       # (Hp, 4Hp) bf16
        "b_comb_p": b_comb.astype(jnp.float32),      # (1, 4Hp) f32
        "w_fc_t_p": w_fc.astype(jnp.bfloat16),       # (Hp, Vp) bf16
        "b_fc_p": b_fc.astype(jnp.float32),          # (1, Vp) f32
    }


# ----------------------------------------------------------------------------
# Pure-JAX f32 reference (lax.scan) for correctness checking
# ----------------------------------------------------------------------------
def decoder_rnn_reference(raw, features, captions):
    captions = captions[:, :-1]
    embeds = jnp.take(raw["embedding"], captions, axis=0)
    inputs = jnp.concatenate([features[:, None, :], embeds], axis=1)   # (B, T, E)
    B = inputs.shape[0]
    H = raw["w_hh_t"].shape[0]
    b_comb = raw["b_ih"] + raw["b_hh"]

    def step(carry, x_t):
        h, c = carry
        gates = x_t @ raw["w_ih_t"] + h @ raw["w_hh_t"] + b_comb
        i_g = jax.nn.sigmoid(gates[:, 0 * H:1 * H])
        f_g = jax.nn.sigmoid(gates[:, 1 * H:2 * H])
        g_g = jnp.tanh(gates[:, 2 * H:3 * H])
        o_g = jax.nn.sigmoid(gates[:, 3 * H:4 * H])
        c_new = f_g * c + i_g * g_g
        h_new = o_g * jnp.tanh(c_new)
        return (h_new, c_new), h_new

    h0 = jnp.zeros((B, H), jnp.float32)
    c0 = jnp.zeros((B, H), jnp.float32)
    _, hs = lax.scan(step, (h0, c0), jnp.transpose(inputs, (1, 0, 2)))  # (T, B, H)
    logits = hs @ raw["w_fc_t"] + raw["b_fc"]                           # (T, B, V)
    return jnp.transpose(logits, (1, 0, 2))


if __name__ == "__main__":
    B = 2        # batch
    E = 32       # embed_size
    H = 32       # hidden_size
    V = 64       # vocab_size
    T_CAP = 8    # caption length (forward sees 1 feature step + 7 embed steps)

    key = jax.random.PRNGKey(0)
    k_par, k_feat, k_cap = jax.random.split(key, 3)

    raw = init_params(k_par, E, H, V)
    params = pad_params(raw, E, H, V)      # one-time pad + bf16 cast
    features = jax.random.normal(k_feat, (B, E), jnp.float32)
    captions = jax.random.randint(k_cap, (B, T_CAP), 0, V, jnp.int32)

    fwd = jax.jit(functools.partial(decoder_rnn_forward, vocab_size=V))
    out = jax.block_until_ready(fwd(params, features, captions))
    ref = jax.block_until_ready(decoder_rnn_reference(raw, features, captions))

    assert out.shape == (B, T_CAP, V), out.shape
    # bf16 MXU operands + bf16 intermediate slabs with f32 accumulation / f32
    # gate math & state -> slightly looser tolerance than the pure-f32 reference.
    max_err = float(jnp.max(jnp.abs(out - ref)))
    assert max_err < 5e-2, max_err

    print("KERNEL_OK")
</pallas_src>

<mosaic_0001>
module attributes {stable_mosaic.version = 11 : i64} {
  func.func @_matmul_bias_kernel(%arg0: i32, %arg1: i32, %arg2: memref<64x128xbf16, #tpu.memory_space<vmem>>, %arg3: memref<128x512xbf16, #tpu.memory_space<vmem>>, %arg4: memref<1x512xf32, #tpu.memory_space<vmem>>, %arg5: memref<64x512xbf16, #tpu.memory_space<vmem>>) attributes {dimension_semantics = [#tpu.dimension_semantics<parallel>, #tpu.dimension_semantics<parallel>], iteration_bounds = array<i64: 1, 1>, scalar_prefetch = 0 : i64, scratch_operands = 0 : i64, tpu.core_type = #tpu.core_type<tc>, window_params = [{transform_indices = @transform_0, window_bounds = array<i64: 64, 128>}, {transform_indices = @transform_1, window_bounds = array<i64: 128, 512>}, {transform_indices = @transform_2, window_bounds = array<i64: 1, 512>}, {transform_indices = @transform_3, window_bounds = array<i64: 64, 512>}]} {
    %c0 = arith.constant 0 : index
    %c0_0 = arith.constant 0 : index
    %0 = vector.load %arg2[%c0, %c0_0] : memref<64x128xbf16, #tpu.memory_space<vmem>>, vector<64x128xbf16>
    %c0_1 = arith.constant 0 : index
    %c0_2 = arith.constant 0 : index
    %1 = vector.load %arg3[%c0_1, %c0_2] : memref<128x512xbf16, #tpu.memory_space<vmem>>, vector<128x512xbf16>
    %cst = arith.constant dense<0.000000e+00> : vector<64x512xf32>
    %2 = tpu.matmul %0, %1, %cst {dimension_numbers = #tpu.dot_dimension_numbers<[1], [0], [0], [1], [0, 0, 1, 1], [], []>} : vector<64x128xbf16>, vector<128x512xbf16>, vector<64x512xf32> -> vector<64x512xf32>
    %c0_3 = arith.constant 0 : index
    %c0_4 = arith.constant 0 : index
    %3 = vector.load %arg4[%c0_3, %c0_4] : memref<1x512xf32, #tpu.memory_space<vmem>>, vector<1x512xf32>
    %4 = vector.broadcast %3 : vector<1x512xf32> to vector<64x512xf32>
    %5 = arith.addf %2, %4 : vector<64x512xf32>
    %6 = arith.truncf %5 : vector<64x512xf32> to vector<64x512xbf16>
    %c0_5 = arith.constant 0 : index
    %c0_6 = arith.constant 0 : index
    %7 = vector.load %arg5[%c0_5, %c0_6] : memref<64x512xbf16, #tpu.memory_space<vmem>>, vector<64x512xbf16>
    tpu.vector_store %arg5[%c0_5, %c0_6], %6 {strides = array<i32>} : memref<64x512xbf16, #tpu.memory_space<vmem>>, vector<64x512xbf16>,
    return
  }
  func.func @transform_0(%arg0: i32, %arg1: i32) -> (i32, i32) {
    %c0_i32 = arith.constant 0 : i32
    %c0_i32_0 = arith.constant 0 : i32
    return %arg0, %c0_i32 : i32, i32
  }
  func.func @transform_1(%arg0: i32, %arg1: i32) -> (i32, i32) {
    %c0_i32 = arith.constant 0 : i32
    %c0_i32_0 = arith.constant 0 : i32
    return %c0_i32, %arg1 : i32, i32
  }
  func.func @transform_2(%arg0: i32, %arg1: i32) -> (i32, i32) {
    %c0_i32 = arith.constant 0 : i32
    %c0_i32_0 = arith.constant 0 : i32
    return %c0_i32, %arg1 : i32, i32
  }
  func.func @transform_3(%arg0: i32, %arg1: i32) -> (i32, i32) {
    %c0_i32 = arith.constant 0 : i32
    return %arg0, %arg1 : i32, i32
  }
}

module attributes {stable_mosaic.version = 11 : i64} {
  func.func @_lstm_chunk_kernel(%arg0: i32, %arg1: memref<8x4096xbf16, #tpu.memory_space<vmem>>, %arg2: memref<128x512xbf16, #tpu.memory_space<vmem>>, %arg3: memref<8x1024xbf16, #tpu.memory_space<vmem>>, %arg4: memref<8x128xf32, #tpu.memory_space<vmem>>, %arg5: memref<8x128xf32, #tpu.memory_space<vmem>>) attributes {dimension_semantics = [#tpu.dimension_semantics<arbitrary>], iteration_bounds = array<i64: 1>, scalar_prefetch = 0 : i64, scratch_operands = 2 : i64, tpu.core_type = #tpu.core_type<tc>, window_params = [{transform_indices = @transform_0, window_bounds = array<i64: 8, 4096>}, {pipeline_mode = #tpu.pipeline_mode<synchronous>, transform_indices = @transform_1, window_bounds = array<i64: 128, 512>}, {transform_indices = @transform_2, window_bounds = array<i64: 8, 1024>}]} {
    %c0_i32 = arith.constant 0 : i32
    %0 = arith.cmpi eq, %arg0, %c0_i32 : i32
    %1 = arith.extui %0 : i1 to i32
    %c0_i32_0 = arith.constant 0 : i32
    %2 = arith.cmpi ne, %1, %c0_i32_0 : i32
    scf.if %2 {
      %cst_60 = arith.constant 0.000000e+00 : f32
      %264 = vector.broadcast %cst_60 : f32 to vector<8x128xf32>
      %c0_61 = arith.constant 0 : index
      %c0_62 = arith.constant 0 : index
      %265 = vector.load %arg4[%c0_61, %c0_62] : memref<8x128xf32, #tpu.memory_space<vmem>>, vector<8x128xf32>
      tpu.vector_store %arg4[%c0_61, %c0_62], %264 {strides = array<i32>} : memref<8x128xf32, #tpu.memory_space<vmem>>, vector<8x128xf32>,
      %cst_63 = arith.constant 0.000000e+00 : f32
      %266 = vector.broadcast %cst_63 : f32 to vector<8x128xf32>
      %c0_64 = arith.constant 0 : index
      %c0_65 = arith.constant 0 : index
      %267 = vector.load %arg5[%c0_64, %c0_65] : memref<8x128xf32, #tpu.memory_space<vmem>>, vector<8x128xf32>
      tpu.vector_store %arg5[%c0_64, %c0_65], %266 {strides = array<i32>} : memref<8x128xf32, #tpu.memory_space<vmem>>, vector<8x128xf32>,
    } else {
    }
    %c0 = arith.constant 0 : index
    %c0_1 = arith.constant 0 : index
    %3 = vector.load %arg4[%c0, %c0_1] : memref<8x128xf32, #tpu.memory_space<vmem>>, vector<8x128xf32>
    %c0_2 = arith.constant 0 : index
    %c0_3 = arith.constant 0 : index
    %4 = vector.load %arg5[%c0_2, %c0_3] : memref<8x128xf32, #tpu.memory_space<vmem>>, vector<8x128xf32>
    %c0_4 = arith.constant 0 : index
    %c0_5 = arith.constant 0 : index
    %5 = vector.load %arg2[%c0_4, %c0_5] : memref<128x512xbf16, #tpu.memory_space<vmem>>, vector<128x512xbf16>
    %c0_6 = arith.constant 0 : index
    %c0_7 = arith.constant 0 : index
    %6 = vector.load %arg1[%c0_6, %c0_7] : memref<8x4096xbf16, #tpu.memory_space<vmem>>, vector<8x512xbf16>
    %7 = arith.extf %6 : vector<8x512xbf16> to vector<8x512xf32>
    %8 = arith.truncf %3 : vector<8x128xf32> to vector<8x128xbf16>
    %cst = arith.constant dense<0.000000e+00> : vector<8x512xf32>
    %9 = tpu.matmul %8, %5, %cst {dimension_numbers = #tpu.dot_dimension_numbers<[1], [0], [0], [1], [0, 0, 1, 1], [], []>} : vector<8x128xbf16>, vector<128x512xbf16>, vector<8x512xf32> -> vector<8x512xf32>
    %10 = arith.addf %7, %9 : vector<8x512xf32>
    %11 = vector.extract_strided_slice %10 {offsets = [0, 0], sizes = [8, 128], strides = [1, 1]} : vector<8x512xf32> to vector<8x128xf32>
    %12 = arith.negf %11 : vector<8x128xf32>
    %13 = math.exp %12 : vector<8x128xf32>
    %cst_8 = arith.constant 1.000000e+00 : f32
    %14 = vector.broadcast %cst_8 : f32 to vector<8x128xf32>
    %15 = arith.addf %14, %13 : vector<8x128xf32>
    %16 = arith.divf %14, %15 : vector<8x128xf32>
    %17 = vector.extract_strided_slice %10 {offsets = [0, 128], sizes = [8, 128], strides = [1, 1]} : vector<8x512xf32> to vector<8x128xf32>
    %18 = arith.negf %17 : vector<8x128xf32>
    %19 = math.exp %18 : vector<8x128xf32>
    %cst_9 = arith.constant 1.000000e+00 : f32
    %20 = vector.broadcast %cst_9 : f32 to vector<8x128xf32>
    %21 = arith.addf %20, %19 : vector<8x128xf32>
    %22 = arith.divf %20, %21 : vector<8x128xf32>
    %23 = vector.extract_strided_slice %10 {offsets = [0, 256], sizes = [8, 128], strides = [1, 1]} : vector<8x512xf32> to vector<8x128xf32>
    %24 = math.tanh %23 : vector<8x128xf32>
    %25 = vector.extract_strided_slice %10 {offsets = [0, 384], sizes = [8, 128], strides = [1, 1]} : vector<8x512xf32> to vector<8x128xf32>
    %26 = arith.negf %25 : vector<8x128xf32>
    %27 = math.exp %26 : vector<8x128xf32>
    %cst_10 = arith.constant 1.000000e+00 : f32
    %28 = vector.broadcast %cst_10 : f32 to vector<8x128xf32>
    %29 = arith.addf %28, %27 : vector<8x128xf32>
    %30 = arith.divf %28, %29 : vector<8x128xf32>
    %31 = arith.mulf %22, %4 : vector<8x128xf32>
    %32 = arith.mulf %16, %24 : vector<8x128xf32>
    %33 = arith.addf %31, %32 : vector<8x128xf32>
    %34 = math.tanh %33 : vector<8x128xf32>
    %35 = arith.mulf %30, %34 : vector<8x128xf32>
    %36 = arith.truncf %35 : vector<8x128xf32> to vector<8x128xbf16>
    %c0_11 = arith.constant 0 : index
    %c0_12 = arith.constant 0 : index
    %37 = vector.load %arg3[%c0_11, %c0_12] : memref<8x1024xbf16, #tpu.memory_space<vmem>>, vector<8x128xbf16>
    tpu.vector_store %arg3[%c0_11, %c0_12], %36 {strides = array<i32>} : memref<8x1024xbf16, #tpu.memory_space<vmem>>, vector<8x128xbf16>,
    %c0_13 = arith.constant 0 : index
    %c512 = arith.constant 512 : index
    %38 = vector.load %arg1[%c0_13, %c512] : memref<8x4096xbf16, #tpu.memory_space<vmem>>, vector<8x512xbf16>
    %39 = arith.extf %38 : vector<8x512xbf16> to vector<8x512xf32>
    %40 = arith.truncf %35 : vector<8x128xf32> to vector<8x128xbf16>
    %cst_14 = arith.constant dense<0.000000e+00> : vector<8x512xf32>
    %41 = tpu.matmul %40, %5, %cst_14 {dimension_numbers = #tpu.dot_dimension_numbers<[1], [0], [0], [1], [0, 0, 1, 1], [], []>} : vector<8x128xbf16>, vector<128x512xbf16>, vector<8x512xf32> -> vector<8x512xf32>
    %42 = arith.addf %39, %41 : vector<8x512xf32>
    %43 = vector.extract_strided_slice %42 {offsets = [0, 0], sizes = [8, 128], strides = [1, 1]} : vector<8x512xf32> to vector<8x128xf32>
    %44 = arith.negf %43 : vector<8x128xf32>
    %45 = math.exp %44 : vector<8x128xf32>
    %cst_15 = arith.constant 1.000000e+00 : f32
    %46 = vector.broadcast %cst_15 : f32 to vector<8x128xf32>
    %47 = arith.addf %46, %45 : vector<8x128xf32>
    %48 = arith.divf %46, %47 : vector<8x128xf32>
    %49 = vector.extract_strided_slice %42 {offsets = [0, 128], sizes = [8, 128], strides = [1, 1]} : vector<8x512xf32> to vector<8x128xf32>
    %50 = arith.negf %49 : vector<8x128xf32>
    %51 = math.exp %50 : vector<8x128xf32>
    %cst_16 = arith.constant 1.000000e+00 : f32
    %52 = vector.broadcast %cst_16 : f32 to vector<8x128xf32>
    %53 = arith.addf %52, %51 : vector<8x128xf32>
    %54 = arith.divf %52, %53 : vector<8x128xf32>
    %55 = vector.extract_strided_slice %42 {offsets = [0, 256], sizes = [8, 128], strides = [1, 1]} : vector<8x512xf32> to vector<8x128xf32>
    %56 = math.tanh %55 : vector<8x128xf32>
    %57 = vector.extract_strided_slice %42 {offsets = [0, 384], sizes = [8, 128], strides = [1, 1]} : vector<8x512xf32> to vector<8x128xf32>
    %58 = arith.negf %57 : vector<8x128xf32>
    %59 = math.exp %58 : vector<8x128xf32>
    %cst_17 = arith.constant 1.000000e+00 : f32
    %60 = vector.broadcast %cst_17 : f32 to vector<8x128xf32>
    %61 = arith.addf %60, %59 : vector<8x128xf32>
    %62 = arith.divf %60, %61 : vector<8x128xf32>
    %63 = arith.mulf %54, %33 : vector<8x128xf32>
    %64 = arith.mulf %48, %56 : vector<8x128xf32>
    %65 = arith.addf %63, %64 : vector<8x128xf32>
    %66 = math.tanh %65 : vector<8x128xf32>
    %67 = arith.mulf %62, %66 : vector<8x128xf32>
    %68 = arith.truncf %67 : vector<8x128xf32> to vector<8x128xbf16>
    %c0_18 = arith.constant 0 : index
    %c128 = arith.constant 128 : index
    %69 = vector.load %arg3[%c0_18, %c128] : memref<8x1024xbf16, #tpu.memory_space<vmem>>, vector<8x128xbf16>
    tpu.vector_store %arg3[%c0_18, %c128], %68 {strides = array<i32>} : memref<8x1024xbf16, #tpu.memory_space<vmem>>, vector<8x128xbf16>,
    %c0_19 = arith.constant 0 : index
    %c1024 = arith.constant 1024 : index
    %70 = vector.load %arg1[%c0_19, %c1024] : memref<8x4096xbf16, #tpu.memory_space<vmem>>, vector<8x512xbf16>
    %71 = arith.extf %70 : vector<8x512xbf16> to vector<8x512xf32>
    %72 = arith.truncf %67 : vector<8x128xf32> to vector<8x128xbf16>
    %cst_20 = arith.constant dense<0.000000e+00> : vector<8x512xf32>
    %73 = tpu.matmul %72, %5, %cst_20 {dimension_numbers = #tpu.dot_dimension_numbers<[1], [0], [0], [1], [0, 0, 1, 1], [], []>} : vector<8x128xbf16>, vector<128x512xbf16>, vector<8x512xf32> -> vector<8x512xf32>
    %74 = arith.addf %71, %73 : vector<8x512xf32>
    %75 = vector.extract_strided_slice %74 {offsets = [0, 0], sizes = [8, 128], strides = [1, 1]} : vector<8x512xf32> to vector<8x128xf32>
    %76 = arith.negf %75 : vector<8x128xf32>
    %77 = math.exp %76 : vector<8x128xf32>
    %cst_21 = arith.constant 1.000000e+00 : f32
    %78 = vector.broadcast %cst_21 : f32 to vector<8x128xf32>
    %79 = arith.addf %78, %77 : vector<8x128xf32>
    %80 = arith.divf %78, %79 : vector<8x128xf32>
    %81 = vector.extract_strided_slice %74 {offsets = [0, 128], sizes = [8, 128], strides = [1, 1]} : vector<8x512xf32> to vector<8x128xf32>
    %82 = arith.negf %81 : vector<8x128xf32>
    %83 = math.exp %82 : vector<8x128xf32>
    %cst_22 = arith.constant 1.000000e+00 : f32
    %84 = vector.broadcast %cst_22 : f32 to vector<8x128xf32>
    %85 = arith.addf %84, %83 : vector<8x128xf32>
    %86 = arith.divf %84, %85 : vector<8x128xf32>
    %87 = vector.extract_strided_slice %74 {offsets = [0, 256], sizes = [8, 128], strides = [1, 1]} : vector<8x512xf32> to vector<8x128xf32>
    %88 = math.tanh %87 : vector<8x128xf32>
    %89 = vector.extract_strided_slice %74 {offsets = [0, 384], sizes = [8, 128], strides = [1, 1]} : vector<8x512xf32> to vector<8x128xf32>
    %90 = arith.negf %89 : vector<8x128xf32>
    %91 = math.exp %90 : vector<8x128xf32>
    %cst_23 = arith.constant 1.000000e+00 : f32
    %92 = vector.broadcast %cst_23 : f32 to vector<8x128xf32>
    %93 = arith.addf %92, %91 : vector<8x128xf32>
    %94 = arith.divf %92, %93 : vector<8x128xf32>
    %95 = arith.mulf %86, %65 : vector<8x128xf32>
    %96 = arith.mulf %80, %88 : vector<8x128xf32>
    %97 = arith.addf %95, %96 : vector<8x128xf32>
    %98 = math.tanh %97 : vector<8x128xf32>
    %99 = arith.mulf %94, %98 : vector<8x128xf32>
    %100 = arith.truncf %99 : vector<8x128xf32> to vector<8x128xbf16>
    %c0_24 = arith.constant 0 : index
    %c256 = arith.constant 256 : index
    %101 = vector.load %arg3[%c0_24, %c256] : memref<8x1024xbf16, #tpu.memory_space<vmem>>, vector<8x128xbf16>
    tpu.vector_store %arg3[%c0_24, %c256], %100 {strides = array<i32>} : memref<8x1024xbf16, #tpu.memory_space<vmem>>, vector<8x128xbf16>,
    %c0_25 = arith.constant 0 : index
    %c1536 = arith.constant 1536 : index
    %102 = vector.load %arg1[%c0_25, %c1536] : memref<8x4096xbf16, #tpu.memory_space<vmem>>, vector<8x512xbf16>
    %103 = arith.extf %102 : vector<8x512xbf16> to vector<8x512xf32>
    %104 = arith.truncf %99 : vector<8x128xf32> to vector<8x128xbf16>
    %cst_26 = arith.constant dense<0.000000e+00> : vector<8x512xf32>
    %105 = tpu.matmul %104, %5, %cst_26 {dimension_numbers = #tpu.dot_dimension_numbers<[1], [0], [0], [1], [0, 0, 1, 1], [], []>} : vector<8x128xbf16>, vector<128x512xbf16>, vector<8x512xf32> -> vector<8x512xf32>
    %106 = arith.addf %103, %105 : vector<8x512xf32>
    %107 = vector.extract_strided_slice %106 {offsets = [0, 0], sizes = [8, 128], strides = [1, 1]} : vector<8x512xf32> to vector<8x128xf32>
    %108 = arith.negf %107 : vector<8x128xf32>
    %109 = math.exp %108 : vector<8x128xf32>
    %cst_27 = arith.constant 1.000000e+00 : f32
    %110 = vector.broadcast %cst_27 : f32 to vector<8x128xf32>
    %111 = arith.addf %110, %109 : vector<8x128xf32>
    %112 = arith.divf %110, %111 : vector<8x128xf32>
    %113 = vector.extract_strided_slice %106 {offsets = [0, 128], sizes = [8, 128], strides = [1, 1]} : vector<8x512xf32> to vector<8x128xf32>
    %114 = arith.negf %113 : vector<8x128xf32>
    %115 = math.exp %114 : vector<8x128xf32>
    %cst_28 = arith.constant 1.000000e+00 : f32
    %116 = vector.broadcast %cst_28 : f32 to vector<8x128xf32>
    %117 = arith.addf %116, %115 : vector<8x128xf32>
    %118 = arith.divf %116, %117 : vector<8x128xf32>
    %119 = vector.extract_strided_slice %106 {offsets = [0, 256], sizes = [8, 128], strides = [1, 1]} : vector<8x512xf32> to vector<8x128xf32>
    %120 = math.tanh %119 : vector<8x128xf32>
    %121 = vector.extract_strided_slice %106 {offsets = [0, 384], sizes = [8, 128], strides = [1, 1]} : vector<8x512xf32> to vector<8x128xf32>
    %122 = arith.negf %121 : vector<8x128xf32>
    %123 = math.exp %122 : vector<8x128xf32>
    %cst_29 = arith.constant 1.000000e+00 : f32
    %124 = vector.broadcast %cst_29 : f32 to vector<8x128xf32>
    %125 = arith.addf %124, %123 : vector<8x128xf32>
    %126 = arith.divf %124, %125 : vector<8x128xf32>
    %127 = arith.mulf %118, %97 : vector<8x128xf32>
    %128 = arith.mulf %112, %120 : vector<8x128xf32>
    %129 = arith.addf %127, %128 : vector<8x128xf32>
    %130 = math.tanh %129 : vector<8x128xf32>
    %131 = arith.mulf %126, %130 : vector<8x128xf32>
    %132 = arith.truncf %131 : vector<8x128xf32> to vector<8x128xbf16>
    %c0_30 = arith.constant 0 : index
    %c384 = arith.constant 384 : index
    %133 = vector.load %arg3[%c0_30, %c384] : memref<8x1024xbf16, #tpu.memory_space<vmem>>, vector<8x128xbf16>
    tpu.vector_store %arg3[%c0_30, %c384], %132 {strides = array<i32>} : memref<8x1024xbf16, #tpu.memory_space<vmem>>, vector<8x128xbf16>,
    %c0_31 = arith.constant 0 : index
    %c2048 = arith.constant 2048 : index
    %134 = vector.load %arg1[%c0_31, %c2048] : memref<8x4096xbf16, #tpu.memory_space<vmem>>, vector<8x512xbf16>
    %135 = arith.extf %134 : vector<8x512xbf16> to vector<8x512xf32>
    %136 = arith.truncf %131 : vector<8x128xf32> to vector<8x128xbf16>
    %cst_32 = arith.constant dense<0.000000e+00> : vector<8x512xf32>
    %137 = tpu.matmul %136, %5, %cst_32 {dimension_numbers = #tpu.dot_dimension_numbers<[1], [0], [0], [1], [0, 0, 1, 1], [], []>} : vector<8x128xbf16>, vector<128x512xbf16>, vector<8x512xf32> -> vector<8x512xf32>
    %138 = arith.addf %135, %137 : vector<8x512xf32>
    %139 = vector.extract_strided_slice %138 {offsets = [0, 0], sizes = [8, 128], strides = [1, 1]} : vector<8x512xf32> to vector<8x128xf32>
    %140 = arith.negf %139 : vector<8x128xf32>
    %141 = math.exp %140 : vector<8x128xf32>
    %cst_33 = arith.constant 1.000000e+00 : f32
    %142 = vector.broadcast %cst_33 : f32 to vector<8x128xf32>
    %143 = arith.addf %142, %141 : vector<8x128xf32>
    %144 = arith.divf %142, %143 : vector<8x128xf32>
    %145 = vector.extract_strided_slice %138 {offsets = [0, 128], sizes = [8, 128], strides = [1, 1]} : vector<8x512xf32> to vector<8x128xf32>
    %146 = arith.negf %145 : vector<8x128xf32>
    %147 = math.exp %146 : vector<8x128xf32>
    %cst_34 = arith.constant 1.000000e+00 : f32
    %148 = vector.broadcast %cst_34 : f32 to vector<8x128xf32>
    %149 = arith.addf %148, %147 : vector<8x128xf32>
    %150 = arith.divf %148, %149 : vector<8x128xf32>
    %151 = vector.extract_strided_slice %138 {offsets = [0, 256], sizes = [8, 128], strides = [1, 1]} : vector<8x512xf32> to vector<8x128xf32>
    %152 = math.tanh %151 : vector<8x128xf32>
    %153 = vector.extract_strided_slice %138 {offsets = [0, 384], sizes = [8, 128], strides = [1, 1]} : vector<8x512xf32> to vector<8x128xf32>
    %154 = arith.negf %153 : vector<8x128xf32>
    %155 = math.exp %154 : vector<8x128xf32>
    %cst_35 = arith.constant 1.000000e+00 : f32
    %156 = vector.broadcast %cst_35 : f32 to vector<8x128xf32>
    %157 = arith.addf %156, %155 : vector<8x128xf32>
    %158 = arith.divf %156, %157 : vector<8x128xf32>
    %159 = arith.mulf %150, %129 : vector<8x128xf32>
    %160 = arith.mulf %144, %152 : vector<8x128xf32>
    %161 = arith.addf %159, %160 : vector<8x128xf32>
    %162 = math.tanh %161 : vector<8x128xf32>
    %163 = arith.mulf %158, %162 : vector<8x128xf32>
    %164 = arith.truncf %163 : vector<8x128xf32> to vector<8x128xbf16>
    %c0_36 = arith.constant 0 : index
    %c512_37 = arith.constant 512 : index
    %165 = vector.load %arg3[%c0_36, %c512_37] : memref<8x1024xbf16, #tpu.memory_space<vmem>>, vector<8x128xbf16>
    tpu.vector_store %arg3[%c0_36, %c512_37], %164 {strides = array<i32>} : memref<8x1024xbf16, #tpu.memory_space<vmem>>, vector<8x128xbf16>,
    %c0_38 = arith.constant 0 : index
    %c2560 = arith.constant 2560 : index
    %166 = vector.load %arg1[%c0_38, %c2560] : memref<8x4096xbf16, #tpu.memory_space<vmem>>, vector<8x512xbf16>
    %167 = arith.extf %166 : vector<8x512xbf16> to vector<8x512xf32>
    %168 = arith.truncf %163 : vector<8x128xf32> to vector<8x128xbf16>
    %cst_39 = arith.constant dense<0.000000e+00> : vector<8x512xf32>
    %169 = tpu.matmul %168, %5, %cst_39 {dimension_numbers = #tpu.dot_dimension_numbers<[1], [0], [0], [1], [0, 0, 1, 1], [], []>} : vector<8x128xbf16>, vector<128x512xbf16>, vector<8x512xf32> -> vector<8x512xf32>
    %170 = arith.addf %167, %169 : vector<8x512xf32>
    %171 = vector.extract_strided_slice %170 {offsets = [0, 0], sizes = [8, 128], strides = [1, 1]} : vector<8x512xf32> to vector<8x128xf32>
    %172 = arith.negf %171 : vector<8x128xf32>
    %173 = math.exp %172 : vector<8x128xf32>
    %cst_40 = arith.constant 1.000000e+00 : f32
    %174 = vector.broadcast %cst_40 : f32 to vector<8x128xf32>
    %175 = arith.addf %174, %173 : vector<8x128xf32>
    %176 = arith.divf %174, %175 : vector<8x128xf32>
    %177 = vector.extract_strided_slice %170 {offsets = [0, 128], sizes = [8, 128], strides = [1, 1]} : vector<8x512xf32> to vector<8x128xf32>
    %178 = arith.negf %177 : vector<8x128xf32>
    %179 = math.exp %178 : vector<8x128xf32>
    %cst_41 = arith.constant 1.000000e+00 : f32
    %180 = vector.broadcast %cst_41 : f32 to vector<8x128xf32>
    %181 = arith.addf %180, %179 : vector<8x128xf32>
    %182 = arith.divf %180, %181 : vector<8x128xf32>
    %183 = vector.extract_strided_slice %170 {offsets = [0, 256], sizes = [8, 128], strides = [1, 1]} : vector<8x512xf32> to vector<8x128xf32>
    %184 = math.tanh %183 : vector<8x128xf32>
    %185 = vector.extract_strided_slice %170 {offsets = [0, 384], sizes = [8, 128], strides = [1, 1]} : vector<8x512xf32> to vector<8x128xf32>
    %186 = arith.negf %185 : vector<8x128xf32>
    %187 = math.exp %186 : vector<8x128xf32>
    %cst_42 = arith.constant 1.000000e+00 : f32
    %188 = vector.broadcast %cst_42 : f32 to vector<8x128xf32>
    %189 = arith.addf %188, %187 : vector<8x128xf32>
    %190 = arith.divf %188, %189 : vector<8x128xf32>
    %191 = arith.mulf %182, %161 : vector<8x128xf32>
    %192 = arith.mulf %176, %184 : vector<8x128xf32>
    %193 = arith.addf %191, %192 : vector<8x128xf32>
    %194 = math.tanh %193 : vector<8x128xf32>
    %195 = arith.mulf %190, %194 : vector<8x128xf32>
    %196 = arith.truncf %195 : vector<8x128xf32> to vector<8x128xbf16>
    %c0_43 = arith.constant 0 : index
    %c640 = arith.constant 640 : index
    %197 = vector.load %arg3[%c0_43, %c640] : memref<8x1024xbf16, #tpu.memory_space<vmem>>, vector<8x128xbf16>
    tpu.vector_store %arg3[%c0_43, %c640], %196 {strides = array<i32>} : memref<8x1024xbf16, #tpu.memory_space<vmem>>, vector<8x128xbf16>,
    %c0_44 = arith.constant 0 : index
    %c3072 = arith.constant 3072 : index
    %198 = vector.load %arg1[%c0_44, %c3072] : memref<8x4096xbf16, #tpu.memory_space<vmem>>, vector<8x512xbf16>
    %199 = arith.extf %198 : vector<8x512xbf16> to vector<8x512xf32>
    %200 = arith.truncf %195 : vector<8x128xf32> to vector<8x128xbf16>
    %cst_45 = arith.constant dense<0.000000e+00> : vector<8x512xf32>
    %201 = tpu.matmul %200, %5, %cst_45 {dimension_numbers = #tpu.dot_dimension_numbers<[1], [0], [0], [1], [0, 0, 1, 1], [], []>} : vector<8x128xbf16>, vector<128x512xbf16>, vector<8x512xf32> -> vector<8x512xf32>
    %202 = arith.addf %199, %201 : vector<8x512xf32>
    %203 = vector.extract_strided_slice %202 {offsets = [0, 0], sizes = [8, 128], strides = [1, 1]} : vector<8x512xf32> to vector<8x128xf32>
    %204 = arith.negf %203 : vector<8x128xf32>
    %205 = math.exp %204 : vector<8x128xf32>
    %cst_46 = arith.constant 1.000000e+00 : f32
    %206 = vector.broadcast %cst_46 : f32 to vector<8x128xf32>
    %207 = arith.addf %206, %205 : vector<8x128xf32>
    %208 = arith.divf %206, %207 : vector<8x128xf32>
    %209 = vector.extract_strided_slice %202 {offsets = [0, 128], sizes = [8, 128], strides = [1, 1]} : vector<8x512xf32> to vector<8x128xf32>
    %210 = arith.negf %209 : vector<8x128xf32>
    %211 = math.exp %210 : vector<8x128xf32>
    %cst_47 = arith.constant 1.000000e+00 : f32
    %212 = vector.broadcast %cst_47 : f32 to vector<8x128xf32>
    %213 = arith.addf %212, %211 : vector<8x128xf32>
    %214 = arith.divf %212, %213 : vector<8x128xf32>
    %215 = vector.extract_strided_slice %202 {offsets = [0, 256], sizes = [8, 128], strides = [1, 1]} : vector<8x512xf32> to vector<8x128xf32>
    %216 = math.tanh %215 : vector<8x128xf32>
    %217 = vector.extract_strided_slice %202 {offsets = [0, 384], sizes = [8, 128], strides = [1, 1]} : vector<8x512xf32> to vector<8x128xf32>
    %218 = arith.negf %217 : vector<8x128xf32>
    %219 = math.exp %218 : vector<8x128xf32>
    %cst_48 = arith.constant 1.000000e+00 : f32
    %220 = vector.broadcast %cst_48 : f32 to vector<8x128xf32>
    %221 = arith.addf %220, %219 : vector<8x128xf32>
    %222 = arith.divf %220, %221 : vector<8x128xf32>
    %223 = arith.mulf %214, %193 : vector<8x128xf32>
    %224 = arith.mulf %208, %216 : vector<8x128xf32>
    %225 = arith.addf %223, %224 : vector<8x128xf32>
    %226 = math.tanh %225 : vector<8x128xf32>
    %227 = arith.mulf %222, %226 : vector<8x128xf32>
    %228 = arith.truncf %227 : vector<8x128xf32> to vector<8x128xbf16>
    %c0_49 = arith.constant 0 : index
    %c768 = arith.constant 768 : index
    %229 = vector.load %arg3[%c0_49, %c768] : memref<8x1024xbf16, #tpu.memory_space<vmem>>, vector<8x128xbf16>
    tpu.vector_store %arg3[%c0_49, %c768], %228 {strides = array<i32>} : memref<8x1024xbf16, #tpu.memory_space<vmem>>, vector<8x128xbf16>,
    %c0_50 = arith.constant 0 : index
    %c3584 = arith.constant 3584 : index
    %230 = vector.load %arg1[%c0_50, %c3584] : memref<8x4096xbf16, #tpu.memory_space<vmem>>, vector<8x512xbf16>
    %231 = arith.extf %230 : vector<8x512xbf16> to vector<8x512xf32>
    %232 = arith.truncf %227 : vector<8x128xf32> to vector<8x128xbf16>
    %cst_51 = arith.constant dense<0.000000e+00> : vector<8x512xf32>
    %233 = tpu.matmul %232, %5, %cst_51 {dimension_numbers = #tpu.dot_dimension_numbers<[1], [0], [0], [1], [0, 0, 1, 1], [], []>} : vector<8x128xbf16>, vector<128x512xbf16>, vector<8x512xf32> -> vector<8x512xf32>
    %234 = arith.addf %231, %233 : vector<8x512xf32>
    %235 = vector.extract_strided_slice %234 {offsets = [0, 0], sizes = [8, 128], strides = [1, 1]} : vector<8x512xf32> to vector<8x128xf32>
    %236 = arith.negf %235 : vector<8x128xf32>
    %237 = math.exp %236 : vector<8x128xf32>
    %cst_52 = arith.constant 1.000000e+00 : f32
    %238 = vector.broadcast %cst_52 : f32 to vector<8x128xf32>
    %239 = arith.addf %238, %237 : vector<8x128xf32>
    %240 = arith.divf %238, %239 : vector<8x128xf32>
    %241 = vector.extract_strided_slice %234 {offsets = [0, 128], sizes = [8, 128], strides = [1, 1]} : vector<8x512xf32> to vector<8x128xf32>
    %242 = arith.negf %241 : vector<8x128xf32>
    %243 = math.exp %242 : vector<8x128xf32>
    %cst_53 = arith.constant 1.000000e+00 : f32
    %244 = vector.broadcast %cst_53 : f32 to vector<8x128xf32>
    %245 = arith.addf %244, %243 : vector<8x128xf32>
    %246 = arith.divf %244, %245 : vector<8x128xf32>
    %247 = vector.extract_strided_slice %234 {offsets = [0, 256], sizes = [8, 128], strides = [1, 1]} : vector<8x512xf32> to vector<8x128xf32>
    %248 = math.tanh %247 : vector<8x128xf32>
    %249 = vector.extract_strided_slice %234 {offsets = [0, 384], sizes = [8, 128], strides = [1, 1]} : vector<8x512xf32> to vector<8x128xf32>
    %250 = arith.negf %249 : vector<8x128xf32>
    %251 = math.exp %250 : vector<8x128xf32>
    %cst_54 = arith.constant 1.000000e+00 : f32
    %252 = vector.broadcast %cst_54 : f32 to vector<8x128xf32>
    %253 = arith.addf %252, %251 : vector<8x128xf32>
    %254 = arith.divf %252, %253 : vector<8x128xf32>
    %255 = arith.mulf %246, %225 : vector<8x128xf32>
    %256 = arith.mulf %240, %248 : vector<8x128xf32>
    %257 = arith.addf %255, %256 : vector<8x128xf32>
    %258 = math.tanh %257 : vector<8x128xf32>
    %259 = arith.mulf %254, %258 : vector<8x128xf32>
    %260 = arith.truncf %259 : vector<8x128xf32> to vector<8x128xbf16>
    %c0_55 = arith.constant 0 : index
    %c896 = arith.constant 896 : index
    %261 = vector.load %arg3[%c0_55, %c896] : memref<8x1024xbf16, #tpu.memory_space<vmem>>, vector<8x128xbf16>
    tpu.vector_store %arg3[%c0_55, %c896], %260 {strides = array<i32>} : memref<8x1024xbf16, #tpu.memory_space<vmem>>, vector<8x128xbf16>,
    %c0_56 = arith.constant 0 : index
    %c0_57 = arith.constant 0 : index
    %262 = vector.load %arg4[%c0_56, %c0_57] : memref<8x128xf32, #tpu.memory_space<vmem>>, vector<8x128xf32>
    tpu.vector_store %arg4[%c0_56, %c0_57], %259 {strides = array<i32>} : memref<8x128xf32, #tpu.memory_space<vmem>>, vector<8x128xf32>,
    %c0_58 = arith.constant 0 : index
    %c0_59 = arith.constant 0 : index
    %263 = vector.load %arg5[%c0_58, %c0_59] : memref<8x128xf32, #tpu.memory_space<vmem>>, vector<8x128xf32>
    tpu.vector_store %arg5[%c0_58, %c0_59], %257 {strides = array<i32>} : memref<8x128xf32, #tpu.memory_space<vmem>>, vector<8x128xf32>,
    return
  }
  func.func @transform_0(%arg0: i32) -> (i32, i32) {
    %c0_i32 = arith.constant 0 : i32
    %c0_i32_0 = arith.constant 0 : i32
    return %c0_i32, %arg0 : i32, i32
  }
  func.func @transform_1(%arg0: i32) -> (i32, i32) {
    %c0_i32 = arith.constant 0 : i32
    %c0_i32_0 = arith.constant 0 : i32
    %c0_i32_1 = arith.constant 0 : i32
    return %c0_i32, %c0_i32_0 : i32, i32
  }
  func.func @transform_2(%arg0: i32) -> (i32, i32) {
    %c0_i32 = arith.constant 0 : i32
    %c0_i32_0 = arith.constant 0 : i32
    return %c0_i32, %arg0 : i32, i32
  }
}

module attributes {stable_mosaic.version = 11 : i64} {
  func.func @_matmul_bias_kernel(%arg0: i32, %arg1: i32, %arg2: memref<64x128xbf16, #tpu.memory_space<vmem>>, %arg3: memref<128x128xbf16, #tpu.memory_space<vmem>>, %arg4: memref<1x128xf32, #tpu.memory_space<vmem>>, %arg5: memref<64x128xf32, #tpu.memory_space<vmem>>) attributes {dimension_semantics = [#tpu.dimension_semantics<parallel>, #tpu.dimension_semantics<parallel>], iteration_bounds = array<i64: 1, 1>, scalar_prefetch = 0 : i64, scratch_operands = 0 : i64, tpu.core_type = #tpu.core_type<tc>, window_params = [{transform_indices = @transform_0, window_bounds = array<i64: 64, 128>}, {transform_indices = @transform_1, window_bounds = array<i64: 128, 128>}, {transform_indices = @transform_2, window_bounds = array<i64: 1, 128>}, {transform_indices = @transform_3, window_bounds = array<i64: 64, 128>}]} {
    %c0 = arith.constant 0 : index
    %c0_0 = arith.constant 0 : index
    %0 = vector.load %arg2[%c0, %c0_0] : memref<64x128xbf16, #tpu.memory_space<vmem>>, vector<64x128xbf16>
    %c0_1 = arith.constant 0 : index
    %c0_2 = arith.constant 0 : index
    %1 = vector.load %arg3[%c0_1, %c0_2] : memref<128x128xbf16, #tpu.memory_space<vmem>>, vector<128x128xbf16>
    %cst = arith.constant dense<0.000000e+00> : vector<64x128xf32>
    %2 = tpu.matmul %0, %1, %cst {dimension_numbers = #tpu.dot_dimension_numbers<[1], [0], [0], [1], [0, 0, 1, 1], [], []>} : vector<64x128xbf16>, vector<128x128xbf16>, vector<64x128xf32> -> vector<64x128xf32>
    %c0_3 = arith.constant 0 : index
    %c0_4 = arith.constant 0 : index
    %3 = vector.load %arg4[%c0_3, %c0_4] : memref<1x128xf32, #tpu.memory_space<vmem>>, vector<1x128xf32>
    %4 = vector.broadcast %3 : vector<1x128xf32> to vector<64x128xf32>
    %5 = arith.addf %2, %4 : vector<64x128xf32>
    %c0_5 = arith.constant 0 : index
    %c0_6 = arith.constant 0 : index
    %6 = vector.load %arg5[%c0_5, %c0_6] : memref<64x128xf32, #tpu.memory_space<vmem>>, vector<64x128xf32>
    tpu.vector_store %arg5[%c0_5, %c0_6], %5 {strides = array<i32>} : memref<64x128xf32, #tpu.memory_space<vmem>>, vector<64x128xf32>,
    return
  }
  func.func @transform_0(%arg0: i32, %arg1: i32) -> (i32, i32) {
    %c0_i32 = arith.constant 0 : i32
    %c0_i32_0 = arith.constant 0 : i32
    return %arg0, %c0_i32 : i32, i32
  }
  func.func @transform_1(%arg0: i32, %arg1: i32) -> (i32, i32) {
    %c0_i32 = arith.constant 0 : i32
    %c0_i32_0 = arith.constant 0 : i32
    return %c0_i32, %arg1 : i32, i32
  }
  func.func @transform_2(%arg0: i32, %arg1: i32) -> (i32, i32) {
    %c0_i32 = arith.constant 0 : i32
    %c0_i32_0 = arith.constant 0 : i32
    return %c0_i32, %arg1 : i32, i32
  }
  func.func @transform_3(%arg0: i32, %arg1: i32) -> (i32, i32) {
    %c0_i32 = arith.constant 0 : i32
    return %arg0, %arg1 : i32, i32
  }
}

</mosaic_0001>

<bundles_post_ra>
// kernel: decoder_rnn_forward.5
= control target key start
LH: loop header
LB: loop body
LE: loop exit
PB: predicated region body
PF: predicated region fallthrough
CT: control target
= control target key end

     0   :  { %s355_s1 = inlined_call_operand.vmem [shape: bf16[128,128], index: 1, kind: input, shape index: {}]   ;;  %s356_s0 = inlined_call_operand.vmem [shape: bf16[64,128], index: 0, kind: input, shape index: {}]   ;;  %s357_s2 = inlined_call_operand.vmem [shape: f32[1,128], index: 2, kind: input, shape index: {}]   ;;  %s358_s3 = inlined_call_operand.vmem [shape: f32[64,128], index: 3, kind: output, shape index: {}]  }
   0x1   :  { %v260_v0 = vld [vmem:[%s355_s1] sm:$0xff]   ;;  %v261_v1 = vld [vmem:[%s355_s1 + $0x8] sm:$0xff]   ;;  %v262_v2 = vld [vmem:[%s355_s1 + $0x10] sm:$0xff]  }
   0x2   :  { %220 = vmatprep.subr.bf16.mxu0 %v260_v0  ;;  %244 = vmatprep.subr.bf16.mxu1 %v260_v0  ;;  %v263_v3 = vld [vmem:[%s355_s1 + $0x18] sm:$0xff]   ;;  %v268_v4 = vld [vmem:[%s356_s0] sm:$0xff]   ;;  %v269_v5 = vld [vmem:[%s356_s0 + $0x10] sm:$0xff]  }
   0x3   :  { %221 = vmatpush3.bf16.msra.mxu0 %v260_v0  ;;  %252 = vmatpush3.bf16.msra.mxu1 %v260_v0  ;;  %v264_v6 = vld [vmem:[%s355_s1 + $0x20] sm:$0xff]   ;;  %v265_v7 = vld [vmem:[%s355_s1 + $0x28] sm:$0xff]   ;;  %v266_v8 = vld [vmem:[%s355_s1 + $0x30] sm:$0xff]  }
   0x4   :  { %222 = vmatprep.subr.bf16.mxu0 %v261_v1  ;;  %245 = vmatprep.subr.bf16.mxu1 %v261_v1  ;;  %v267_v9 = vld [vmem:[%s355_s1 + $0x38] sm:$0xff]   ;;  %v270_v10 = vld [vmem:[%s356_s0 + $0x8] sm:$0xff]   ;;  %v195_v12 = vld [vmem:[%s357_s2] ss:$0 sm:$0xff] }
   0x5   :  { %236 = vmatprep.mubr.bf16.mxu0 %v268_v4  ;;  %240 = vmatprep.mubr.bf16.mxu1 %v269_v5  ;;  %v271_v11 = vld [vmem:[%s356_s0 + $0x18] sm:$0xff]  }
   0x7   :  { %223 = vmatpush3.bf16.msra.mxu0 %v261_v1  ;;  %253 = vmatpush3.bf16.msra.mxu1 %v261_v1 }
   0x8   :  { %224 = vmatprep.subr.bf16.mxu0 %v262_v2  ;;  %246 = vmatprep.subr.bf16.mxu1 %v262_v2 }
   0xb   :  { %225 = vmatpush3.bf16.msra.mxu0 %v262_v2  ;;  %254 = vmatpush3.bf16.msra.mxu1 %v262_v2 }
   0xc   :  { %226 = vmatprep.subr.bf16.mxu0 %v263_v3  ;;  %247 = vmatprep.subr.bf16.mxu1 %v263_v3 }
   0xf   :  { %227 = vmatpush3.bf16.msra.mxu0 %v263_v3  ;;  %255 = vmatpush3.bf16.msra.mxu1 %v263_v3 }
  0x10   :  { %228 = vmatprep.subr.bf16.mxu0 %v264_v6  ;;  %248 = vmatprep.subr.bf16.mxu1 %v264_v6 }
  0x13   :  { %229 = vmatpush3.bf16.msra.mxu0 %v264_v6  ;;  %256 = vmatpush3.bf16.msra.mxu1 %v264_v6 }
  0x14   :  { %230 = vmatprep.subr.bf16.mxu0 %v265_v7  ;;  %249 = vmatprep.subr.bf16.mxu1 %v265_v7 }
  0x17   :  { %231 = vmatpush3.bf16.msra.mxu0 %v265_v7  ;;  %257 = vmatpush3.bf16.msra.mxu1 %v265_v7 }
  0x18   :  { %232 = vmatprep.subr.bf16.mxu0 %v266_v8  ;;  %250 = vmatprep.subr.bf16.mxu1 %v266_v8 }
  0x1b   :  { %233 = vmatpush3.bf16.msra.mxu0 %v266_v8  ;;  %258 = vmatpush3.bf16.msra.mxu1 %v266_v8 }
  0x1c   :  { %234 = vmatprep.subr.bf16.mxu0 %v267_v9  ;;  %251 = vmatprep.subr.bf16.mxu1 %v267_v9 }
  0x1f   :  { %235 = vmatpush3.bf16.msra.mxu0 %v267_v9  ;;  %259 = vmatpush3.bf16.msra.mxu1 %v267_v9 }
  0x22   :  { %237 = vmatmul.mubr.bf16.vlgmr.msra.gmra.mrb[0].mxu0 %v270_v10  ;;  %241 = vmatmul.mubr.bf16.vlgmr.msra.gmra.mrb[0].mxu1 %v271_v11 }
  0xf5   :  { %v238_v13 = vpop.f32.mrb[0].mxu0  ;;  %v242_v14 = vpop.f32.mrb[0].mxu1 }
  0xf6   :  { %v161_v15 = vadd.f32 %v238_v13, %v195_v12  ;;  %v177_v16 = vadd.f32 %v242_v14, %v195_v12  ;;  %v152_v17 = vpop.f32.mrb[1].mxu0  ;;  %v168_v18 = vpop.f32.mrb[1].mxu1 }
  0xf7   :  { %v153_v19 = vadd.f32 %v195_v12, %v152_v17  ;;  %v169_v20 = vadd.f32 %v195_v12, %v168_v18  ;;  %v239_v21 = vpop.f32.mrb[2].mxu0  ;;  %v243_v22 = vpop.f32.mrb[2].mxu1 }
  0xf8   :  { %185 = vst [vmem:[%s358_s3 + $0x10] sm:$0xff] %v161_v15  ;;  %189 = vst [vmem:[%s358_s3 + $0x30] sm:$0xff] %v177_v16  ;;  %v164_v23 = vadd.f32 %v239_v21, %v195_v12  ;;  %v180_v24 = vadd.f32 %v243_v22, %v195_v12  ;;  %v155_v25 = vpop.f32.mrb[3].mxu0  ;;  %v171_v26 = vpop.f32.mrb[3].mxu1 }
  0xf9   :  { %183 = vst [vmem:[%s358_s3] sm:$0xff] %v153_v19  ;;  %187 = vst [vmem:[%s358_s3 + $0x20] sm:$0xff] %v169_v20  ;;  %v156_v27 = vadd.f32 %v195_v12, %v155_v25  ;;  %v172_v28 = vadd.f32 %v195_v12, %v171_v26 }
  0xfa   :  { %186 = vst [vmem:[%s358_s3 + $0x18] sm:$0xff] %v164_v23  ;;  %190 = vst [vmem:[%s358_s3 + $0x38] sm:$0xff] %v180_v24 }
  0xfb   :  { %184 = vst [vmem:[%s358_s3 + $0x8] sm:$0xff] %v156_v27  ;;  %188 = vst [vmem:[%s358_s3 + $0x28] sm:$0xff] %v172_v28 }

// kernel: decoder_rnn_forward.3
= control target key start
LH: loop header
LB: loop body
LE: loop exit
PB: predicated region body
PF: predicated region fallthrough
CT: control target
= control target key end

     0   :  { %8 = vsyncpa [#allocation3], 0  ;;  %s686_s12 = smov [#allocation2]   ;;  %s833_s0 = inlined_call_operand.vmem [shape: bf16[64,128], index: 0, kind: input, shape index: {}]   ;;  %s834_s1 = inlined_call_operand.hbm [shape: bf16[128,512], index: 1, kind: input, shape index: {}]   ;;  %s835_s2 = inlined_call_operand.vmem [shape: f32[1,512], index: 2, kind: input, shape index: {}]   ;;  %s836_s3 = inlined_call_operand.vmem [shape: bf16[64,512], index: 3, kind: output, shape index: {}]  }
   0x1   :  { %s16_s13 = sshll.u32 %s686_s12, 4  ;;  %s662_s16 = scalar_lea.hbm %s834_s1, 4096  ;;  %s17_s13 = int_to_ptr.vmem [resolvable:$true] %s16_s13 }
   0x2   :  { %p663_p0 = scmp.ne.s32.totalorder %s834_s1, %s662_s16  ;;  %p666_p1 = scmp.lt.u32.totalorder %s662_s16, %s834_s1 }
   0x4   :  { %p668_p2 = pnand %p666_p1, %p663_p0 }
   0x6   :  { %671 = shalt.err (!%p668_p2)
}
   0x7   :  { %s672_s21 = scalar_lea.vmem %s17_s13, 4096  ;;  %p677_p4 = scmp.lt.s32.totalorder %s17_s13, %s17_s13 }
   0x8   :  { %p673_p3 = scmp.ne.s32.totalorder %s17_s13, %s672_s21  ;;  %p678_p5 = scmp.lt.s32.totalorder %s672_s21, %s672_s21 }
   0xa   :  { %p679_p6 = por %p678_p5, %p677_p4 }
   0xc   :  { %p680_p7 = pnand %p679_p6, %p673_p3 }
   0xe   :  { %683 = shalt.err (!%p680_p7)
}
   0xf   :  { %s687_s22 = smov 256   ;;  %s688_s23 = smov 16  }
  0x10   :  { %22 = dma.hbm_to_vmem [thread:$0]  %s834_s1, 4096, %s17_s13, [#allocation3], %s687_s22, %s687_s22, %s688_s23  }
  0x11   :  { %684 = dma.done.wait [#allocation3], 4096  }
  0x12   :  { %685 = vsyncadd [#allocation3], 4294963200  ;;  %v689_v0 = vmov 0   ;;  %v610_v1 = vld [vmem:[#allocation2 + $0x4] ss:$16 sps:$4 sm:$0xff]   ;;  %v659_v34 = vld [vmem:[%s833_s0 + $0x8] sm:$0xff]   ;;  %v71_v37 = vlaneseq }
  0x13   :  { %307 = vmatprep.mubr.bf16.mxu0 %v689_v0  ;;  %380 = vmatprep.mubr.bf16.mxu1 %v689_v0  ;;  %v612_v2 = vld [vmem:[#allocation2 + $0xc] ss:$16 sps:$4 sm:$0xff]   ;;  %v614_v3 = vld [vmem:[#allocation2] ss:$16 sps:$4 sm:$0xff]   ;;  %v615_v4 = vld [vmem:[#allocation2 + $0x8] ss:$16 sps:$4 sm:$0xff]  }
  0x14   :  { %275 = vmatprep.subr.bf16.mxu0 %v610_v1  ;;  %348 = vmatprep.subr.bf16.mxu1 %v612_v2  ;;  %v616_v5 = vld [vmem:[#allocation2 + $0x24] ss:$16 sps:$4 sm:$0xff]   ;;  %v618_v6 = vld [vmem:[#allocation2 + $0x2c] ss:$16 sps:$4 sm:$0xff]   ;;  %v620_v7 = vld [vmem:[#allocation2 + $0x20] ss:$16 sps:$4 sm:$0xff]  }
  0x15   :  { %276 = vmatpush1.bf16.msra.mxu0 %v614_v3  ;;  %349 = vmatpush1.bf16.msra.mxu1 %v615_v4  ;;  %v621_v8 = vld [vmem:[#allocation2 + $0x28] ss:$16 sps:$4 sm:$0xff]   ;;  %v622_v9 = vld [vmem:[#allocation2 + $0x44] ss:$16 sps:$4 sm:$0xff]   ;;  %v624_v10 = vld [vmem:[#allocation2 + $0x4c] ss:$16 sps:$4 sm:$0xff]  }
  0x16   :  { %277 = vmatprep.subr.bf16.mxu0 %v616_v5  ;;  %350 = vmatprep.subr.bf16.mxu1 %v618_v6  ;;  %v626_v11 = vld [vmem:[#allocation2 + $0x40] ss:$16 sps:$4 sm:$0xff]   ;;  %v627_v12 = vld [vmem:[#allocation2 + $0x48] ss:$16 sps:$4 sm:$0xff]   ;;  %v628_v13 = vld [vmem:[#allocation2 + $0x64] ss:$16 sps:$4 sm:$0xff]  }
  0x17   :  { %v630_v14 = vld [vmem:[#allocation2 + $0x6c] ss:$16 sps:$4 sm:$0xff]   ;;  %v632_v15 = vld [vmem:[#allocation2 + $0x60] ss:$16 sps:$4 sm:$0xff]   ;;  %v633_v16 = vld [vmem:[#allocation2 + $0x68] ss:$16 sps:$4 sm:$0xff]  }
  0x18   :  { %v634_v17 = vld [vmem:[#allocation2 + $0x84] ss:$16 sps:$4 sm:$0xff]   ;;  %v636_v18 = vld [vmem:[#allocation2 + $0x8c] ss:$16 sps:$4 sm:$0xff]   ;;  %v638_v19 = vld [vmem:[#allocation2 + $0x80] ss:$16 sps:$4 sm:$0xff]  }
  0x19   :  { %278 = vmatpush1.bf16.msra.mxu0 %v620_v7  ;;  %351 = vmatpush1.bf16.msra.mxu1 %v621_v8  ;;  %v639_v20 = vld [vmem:[#allocation2 + $0x88] ss:$16 sps:$4 sm:$0xff]   ;;  %v640_v21 = vld [vmem:[#allocation2 + $0xa4] ss:$16 sps:$4 sm:$0xff]   ;;  %v642_v22 = vld [vmem:[#allocation2 + $0xac] ss:$16 sps:$4 sm:$0xff]  }
  0x1a   :  { %279 = vmatprep.subr.bf16.mxu0 %v622_v9  ;;  %352 = vmatprep.subr.bf16.mxu1 %v624_v10  ;;  %v644_v23 = vld [vmem:[#allocation2 + $0xa0] ss:$16 sps:$4 sm:$0xff]   ;;  %v645_v24 = vld [vmem:[#allocation2 + $0xa8] ss:$16 sps:$4 sm:$0xff]   ;;  %v646_v25 = vld [vmem:[#allocation2 + $0xc4] ss:$16 sps:$4 sm:$0xff]  }
  0x1b   :  { %v648_v26 = vld [vmem:[#allocation2 + $0xcc] ss:$16 sps:$4 sm:$0xff]   ;;  %v650_v27 = vld [vmem:[#allocation2 + $0xc0] ss:$16 sps:$4 sm:$0xff]   ;;  %v651_v28 = vld [vmem:[#allocation2 + $0xc8] ss:$16 sps:$4 sm:$0xff]  }
  0x1c   :  { %v652_v29 = vld [vmem:[#allocation2 + $0xe4] ss:$16 sps:$4 sm:$0xff]   ;;  %v654_v30 = vld [vmem:[#allocation2 + $0xec] ss:$16 sps:$4 sm:$0xff]   ;;  %v656_v31 = vld [vmem:[#allocation2 + $0xe0] ss:$16 sps:$4 sm:$0xff]  }
  0x1d   :  { %280 = vmatpush1.bf16.msra.mxu0 %v626_v11  ;;  %353 = vmatpush1.bf16.msra.mxu1 %v627_v12  ;;  %v657_v32 = vld [vmem:[#allocation2 + $0xe8] ss:$16 sps:$4 sm:$0xff]   ;;  %v658_v33 = vld [vmem:[%s833_s0] sm:$0xff]   ;;  %v660_v35 = vld [vmem:[%s833_s0 + $0x10] sm:$0xff]   ;;  %v72_v38 = vshrl.u32 %v71_v37, 7 }
  0x1e   :  { %281 = vmatprep.subr.bf16.mxu0 %v628_v13  ;;  %354 = vmatprep.subr.bf16.mxu1 %v630_v14  ;;  %v661_v36 = vld [vmem:[%s833_s0 + $0x18] sm:$0xff]   ;;  %v69_v41 = vld [vmem:[%s835_s2] sm:$0xf] }
  0x1f   :  { %v73_v39 = vsub.s32 0, %v72_v38  ;;  %v81_v40 = vsub.s32 2, %v72_v38  ;;  %v77_v42 = vsub.s32 1, %v72_v38  ;;  %v85_v43 = vsub.s32 3, %v72_v38 }
  0x21   :  { %282 = vmatpush1.bf16.msra.mxu0 %v632_v15  ;;  %355 = vmatpush1.bf16.msra.mxu1 %v633_v16  ;;  %v745_v44 = vrot.slane %v69_v41, %v73_v39  ;;  %v747_v45 = vrot.slane %v69_v41, %v81_v40  ;;  %v749_v46 = vrot.slane %v69_v41, %v77_v42 }
  0x22   :  { %283 = vmatprep.subr.bf16.mxu0 %v634_v17  ;;  %356 = vmatprep.subr.bf16.mxu1 %v636_v18  ;;  %v751_v47 = vrot.slane %v69_v41, %v85_v43 }
  0x25   :  { %284 = vmatpush1.bf16.msra.mxu0 %v638_v19  ;;  %357 = vmatpush1.bf16.msra.mxu1 %v639_v20 }
  0x26   :  { %285 = vmatprep.subr.bf16.mxu0 %v640_v21  ;;  %358 = vmatprep.subr.bf16.mxu1 %v642_v22 }
  0x29   :  { %286 = vmatpush1.bf16.msra.mxu0 %v644_v23  ;;  %359 = vmatpush1.bf16.msra.mxu1 %v645_v24 }
  0x2a   :  { %287 = vmatprep.subr.bf16.mxu0 %v646_v25  ;;  %360 = vmatprep.subr.bf16.mxu1 %v648_v26 }
  0x2d   :  { %288 = vmatpush1.bf16.msra.mxu0 %v650_v27  ;;  %361 = vmatpush1.bf16.msra.mxu1 %v651_v28 }
  0x2e   :  { %289 = vmatprep.subr.bf16.mxu0 %v652_v29  ;;  %362 = vmatprep.subr.bf16.mxu1 %v654_v30 }
  0x31   :  { %290 = vmatpush1.bf16.msra.mxu0 %v656_v31  ;;  %363 = vmatpush1.bf16.msra.mxu1 %v657_v32 }
  0x34   :  { %308 = vmatmul.mubr.bf16.vlgmr.msra.gmra.mrb[0].mxu0 %v658_v33  ;;  %381 = vmatmul.mubr.bf16.vlgmr.msra.gmra.mrb[0].mxu1 %v658_v33 }
  0x35   :  { %317 = vmatprep.mubr.bf16.mxu0 %v689_v0  ;;  %390 = vmatprep.mubr.bf16.mxu1 %v689_v0 }
  0x3c   :  { %318 = vmatmul.mubr.bf16.gmra.mrb[4].mxu0 %v659_v34  ;;  %391 = vmatmul.mubr.bf16.gmra.mrb[4].mxu1 %v659_v34 }
  0x3d   :  { %327 = vmatprep.mubr.bf16.mxu0 %v689_v0  ;;  %400 = vmatprep.mubr.bf16.mxu1 %v689_v0 }
  0x44   :  { %328 = vmatmul.mubr.bf16.gmra.mrb[8].mxu0 %v660_v35  ;;  %401 = vmatmul.mubr.bf16.gmra.mrb[8].mxu1 %v660_v35 }
  0x45   :  { %337 = vmatprep.mubr.bf16.mxu0 %v689_v0  ;;  %410 = vmatprep.mubr.bf16.mxu1 %v689_v0 }
  0x4c   :  { %338 = vmatmul.mubr.bf16.gmra.mrb[12].mxu0 %v661_v36  ;;  %411 = vmatmul.mubr.bf16.gmra.mrb[12].mxu1 %v661_v36 }
 0x107   :  { %v309_v48 = vpop.f32.mrb[0].mxu0  ;;  %v382_v49 = vpop.f32.mrb[0].mxu1 }
 0x108   :  { %v310_v50 = vadd.f32 %v309_v48, %v745_v44  ;;  %v383_v51 = vadd.f32 %v382_v49, %v747_v45  ;;  %v311_v52 = vpop.f32.mrb[1].mxu0  ;;  %v384_v53 = vpop.f32.mrb[1].mxu1 }
 0x109   :  { %v312_v54 = vadd.f32 %v311_v52, %v749_v46  ;;  %v385_v55 = vadd.f32 %v384_v53, %v751_v47  ;;  %v313_v56 = vpop.f32.mrb[2].mxu0  ;;  %v386_v57 = vpop.f32.mrb[2].mxu1 }
 0x10a   :  { %v314_v58 = vadd.f32 %v313_v56, %v745_v44  ;;  %v387_v59 = vadd.f32 %v386_v57, %v747_v45  ;;  %v315_v60 = vpop.f32.mrb[3].mxu0  ;;  %v388_v61 = vpop.f32.mrb[3].mxu1 }
 0x10b   :  { %v590_v62 = vpack.c.bf16 %v312_v54, %v310_v50  ;;  %v591_v63 = vpack.c.bf16 %v385_v55, %v383_v51  ;;  %v316_v0 = vadd.f32 %v315_v60, %v749_v46  ;;  %v389_v1 = vadd.f32 %v388_v61, %v751_v47 }
 0x10d   :  { %517 = vst [vmem:[%s836_s3] sm:$0xff] %v590_v62  ;;  %518 = vst [vmem:[%s836_s3 + $0x8] sm:$0xff] %v591_v63  ;;  %v592_v2 = vpack.c.bf16 %v316_v0, %v314_v58  ;;  %v593_v3 = vpack.c.bf16 %v389_v1, %v387_v59 }
 0x10f   :  { %519 = vst [vmem:[%s836_s3 + $0x10] sm:$0xff] %v592_v2  ;;  %520 = vst [vmem:[%s836_s3 + $0x18] sm:$0xff] %v593_v3  ;;  %v319_v4 = vpop.f32.mrb[4].mxu0  ;;  %v392_v5 = vpop.f32.mrb[4].mxu1 }
 0x110   :  { %v320_v6 = vadd.f32 %v319_v4, %v745_v44  ;;  %v393_v7 = vadd.f32 %v392_v5, %v747_v45  ;;  %v321_v8 = vpop.f32.mrb[5].mxu0  ;;  %v394_v9 = vpop.f32.mrb[5].mxu1 }
 0x111   :  { %v322_v10 = vadd.f32 %v321_v8, %v749_v46  ;;  %v395_v11 = vadd.f32 %v394_v9, %v751_v47  ;;  %v323_v12 = vpop.f32.mrb[6].mxu0  ;;  %v396_v13 = vpop.f32.mrb[6].mxu1 }
 0x112   :  { %v324_v14 = vadd.f32 %v323_v12, %v745_v44  ;;  %v397_v15 = vadd.f32 %v396_v13, %v747_v45  ;;  %v325_v16 = vpop.f32.mrb[7].mxu0  ;;  %v398_v17 = vpop.f32.mrb[7].mxu1 }
 0x113   :  { %v594_v18 = vpack.c.bf16 %v322_v10, %v320_v6  ;;  %v595_v19 = vpack.c.bf16 %v395_v11, %v393_v7  ;;  %v326_v20 = vadd.f32 %v325_v16, %v749_v46  ;;  %v399_v21 = vadd.f32 %v398_v17, %v751_v47 }
 0x115   :  { %521 = vst [vmem:[%s836_s3 + $0x20] sm:$0xff] %v594_v18  ;;  %522 = vst [vmem:[%s836_s3 + $0x28] sm:$0xff] %v595_v19  ;;  %v596_v22 = vpack.c.bf16 %v326_v20, %v324_v14  ;;  %v597_v23 = vpack.c.bf16 %v399_v21, %v397_v15 }
 0x117   :  { %523 = vst [vmem:[%s836_s3 + $0x30] sm:$0xff] %v596_v22  ;;  %524 = vst [vmem:[%s836_s3 + $0x38] sm:$0xff] %v597_v23  ;;  %v329_v24 = vpop.f32.mrb[8].mxu0  ;;  %v402_v25 = vpop.f32.mrb[8].mxu1 }
 0x118   :  { %v330_v26 = vadd.f32 %v329_v24, %v745_v44  ;;  %v403_v27 = vadd.f32 %v402_v25, %v747_v45  ;;  %v331_v28 = vpop.f32.mrb[9].mxu0  ;;  %v404_v29 = vpop.f32.mrb[9].mxu1 }
 0x119   :  { %v332_v30 = vadd.f32 %v331_v28, %v749_v46  ;;  %v405_v31 = vadd.f32 %v404_v29, %v751_v47  ;;  %v333_v32 = vpop.f32.mrb[10].mxu0  ;;  %v406_v33 = vpop.f32.mrb[10].mxu1 }
 0x11a   :  { %v334_v34 = vadd.f32 %v333_v32, %v745_v44  ;;  %v407_v35 = vadd.f32 %v406_v33, %v747_v45  ;;  %v335_v36 = vpop.f32.mrb[11].mxu0  ;;  %v408_v37 = vpop.f32.mrb[11].mxu1 }
 0x11b   :  { %v598_v38 = vpack.c.bf16 %v332_v30, %v330_v26  ;;  %v599_v39 = vpack.c.bf16 %v405_v31, %v403_v27  ;;  %v336_v40 = vadd.f32 %v335_v36, %v749_v46  ;;  %v409_v41 = vadd.f32 %v408_v37, %v751_v47 }
 0x11d   :  { %525 = vst [vmem:[%s836_s3 + $0x40] sm:$0xff] %v598_v38  ;;  %526 = vst [vmem:[%s836_s3 + $0x48] sm:$0xff] %v599_v39  ;;  %v600_v42 = vpack.c.bf16 %v336_v40, %v334_v34  ;;  %v601_v43 = vpack.c.bf16 %v409_v41, %v407_v35 }
 0x11f   :  { %527 = vst [vmem:[%s836_s3 + $0x50] sm:$0xff] %v600_v42  ;;  %528 = vst [vmem:[%s836_s3 + $0x58] sm:$0xff] %v601_v43  ;;  %v339_v48 = vpop.f32.mrb[12].mxu0  ;;  %v412_v49 = vpop.f32.mrb[12].mxu1 }
 0x120   :  { %v340_v50 = vadd.f32 %v339_v48, %v745_v44  ;;  %v413_v51 = vadd.f32 %v412_v49, %v747_v45  ;;  %v341_v52 = vpop.f32.mrb[13].mxu0  ;;  %v414_v53 = vpop.f32.mrb[13].mxu1 }
 0x121   :  { %v342_v54 = vadd.f32 %v341_v52, %v749_v46  ;;  %v415_v55 = vadd.f32 %v414_v53, %v751_v47  ;;  %v343_v56 = vpop.f32.mrb[14].mxu0  ;;  %v416_v57 = vpop.f32.mrb[14].mxu1 }
 0x122   :  { %v344_v58 = vadd.f32 %v343_v56, %v745_v44  ;;  %v417_v59 = vadd.f32 %v416_v57, %v747_v45  ;;  %v345_v60 = vpop.f32.mrb[15].mxu0  ;;  %v418_v61 = vpop.f32.mrb[15].mxu1 }
 0x123   :  { %v602_v62 = vpack.c.bf16 %v342_v54, %v340_v50  ;;  %v603_v63 = vpack.c.bf16 %v415_v55, %v413_v51  ;;  %v346_v0 = vadd.f32 %v345_v60, %v749_v46  ;;  %v419_v1 = vadd.f32 %v418_v61, %v751_v47 }
 0x125   :  { %529 = vst [vmem:[%s836_s3 + $0x60] sm:$0xff] %v602_v62  ;;  %530 = vst [vmem:[%s836_s3 + $0x68] sm:$0xff] %v603_v63  ;;  %v604_v2 = vpack.c.bf16 %v346_v0, %v344_v58  ;;  %v605_v44 = vpack.c.bf16 %v419_v1, %v417_v59 }
 0x127   :  { %531 = vst [vmem:[%s836_s3 + $0x70] sm:$0xff] %v604_v2  ;;  %532 = vst [vmem:[%s836_s3 + $0x78] sm:$0xff] %v605_v44 }
 0x128   :  { %537 = vsyncpa [#allocation3], 1 }

// kernel: decoder_rnn_forward.4
= control target key start
LH: loop header
LB: loop body
LE: loop exit
PB: predicated region body
PF: predicated region fallthrough
CT: control target
= control target key end

     0   :  { %v1429_v1 = vmov 0   ;;  %v1430_v33 = vmov 0.0|0.0   ;;  %s2038_s1 = inlined_call_operand.vmem [shape: bf16[128,512], index: 1, kind: input, shape index: {}]   ;;  %s2039_s0 = inlined_call_operand.vmem [shape: bf16[8,4096], index: 0, kind: input, shape index: {}]   ;;  %s2040_s2 = inlined_call_operand.vmem [shape: bf16[8,1024], index: 2, kind: output, shape index: {}]  }
   0x1   :  { %v1449_v0 = vld [vmem:[%s2038_s1 + $0x4] ss:$16 sps:$4 sm:$0xff]   ;;  %251 = vmatprep.mubr.bf16.mxu0 %v1429_v1  ;;  %292 = vmatprep.mubr.bf16.mxu1 %v1429_v1  ;;  %v1456_v2 = vld [vmem:[%s2038_s1] ss:$16 sps:$4 sm:$0xff]   ;;  %v1479_v6 = vld [vmem:[%s2038_s1 + $0xc] ss:$16 sps:$4 sm:$0xff]  }
   0x2   :  { %219 = vmatprep.subr.bf16.mxu0 %v1449_v0  ;;  %v1462_v3 = vld [vmem:[%s2038_s1 + $0x24] ss:$16 sps:$4 sm:$0xff]   ;;  %v1468_v4 = vld [vmem:[%s2038_s1 + $0x20] ss:$16 sps:$4 sm:$0xff]   ;;  %v1484_v7 = vld [vmem:[%s2038_s1 + $0x8] ss:$16 sps:$4 sm:$0xff]   ;;  %260 = vmatprep.subr.bf16.mxu1 %v1479_v6 }
   0x3   :  { %220 = vmatpush1.bf16.msra.mxu0 %v1456_v2  ;;  %v1474_v5 = vld [vmem:[%s2038_s1 + $0x44] ss:$16 sps:$4 sm:$0xff]   ;;  %v1490_v8 = vld [vmem:[%s2038_s1 + $0x40] ss:$16 sps:$4 sm:$0xff]   ;;  %261 = vmatpush1.bf16.msra.mxu1 %v1484_v7  ;;  %v1503_v10 = vld [vmem:[%s2038_s1 + $0x2c] ss:$16 sps:$4 sm:$0xff]  }
   0x4   :  { %221 = vmatprep.subr.bf16.mxu0 %v1462_v3  ;;  %v1497_v9 = vld [vmem:[%s2038_s1 + $0x64] ss:$16 sps:$4 sm:$0xff]   ;;  %v1508_v11 = vld [vmem:[%s2038_s1 + $0x28] ss:$16 sps:$4 sm:$0xff]   ;;  %262 = vmatprep.subr.bf16.mxu1 %v1503_v10  ;;  %v1515_v12 = vld [vmem:[%s2038_s1 + $0x60] ss:$16 sps:$4 sm:$0xff]  }
   0x5   :  { %v1520_v13 = vld [vmem:[%s2038_s1 + $0x84] ss:$16 sps:$4 sm:$0xff]   ;;  %v1525_v14 = vld [vmem:[%s2038_s1 + $0x4c] ss:$16 sps:$4 sm:$0xff]   ;;  %v1532_v15 = vld [vmem:[%s2038_s1 + $0x48] ss:$16 sps:$4 sm:$0xff]  }
   0x6   :  { %v1538_v16 = vld [vmem:[%s2038_s1 + $0x6c] ss:$16 sps:$4 sm:$0xff]   ;;  %v1544_v17 = vld [vmem:[%s2038_s1 + $0x80] ss:$16 sps:$4 sm:$0xff]   ;;  %v1550_v18 = vld [vmem:[%s2038_s1 + $0xa4] ss:$16 sps:$4 sm:$0xff]  }
   0x7   :  { %222 = vmatpush1.bf16.msra.mxu0 %v1468_v4  ;;  %263 = vmatpush1.bf16.msra.mxu1 %v1508_v11  ;;  %v1556_v19 = vld [vmem:[%s2038_s1 + $0x68] ss:$16 sps:$4 sm:$0xff]   ;;  %v1562_v20 = vld [vmem:[%s2038_s1 + $0x8c] ss:$16 sps:$4 sm:$0xff]   ;;  %v1568_v21 = vld [vmem:[%s2038_s1 + $0xa0] ss:$16 sps:$4 sm:$0xff]  }
   0x8   :  { %223 = vmatprep.subr.bf16.mxu0 %v1474_v5  ;;  %264 = vmatprep.subr.bf16.mxu1 %v1525_v14  ;;  %v1573_v22 = vld [vmem:[%s2038_s1 + $0xc4] ss:$16 sps:$4 sm:$0xff]   ;;  %v1580_v23 = vld [vmem:[%s2038_s1 + $0x88] ss:$16 sps:$4 sm:$0xff]   ;;  %v1586_v24 = vld [vmem:[%s2038_s1 + $0xac] ss:$16 sps:$4 sm:$0xff]  }
   0x9   :  { %v1592_v25 = vld [vmem:[%s2038_s1 + $0xc0] ss:$16 sps:$4 sm:$0xff]   ;;  %v1598_v26 = vld [vmem:[%s2038_s1 + $0xe4] ss:$16 sps:$4 sm:$0xff]   ;;  %v1604_v27 = vld [vmem:[%s2038_s1 + $0xa8] ss:$16 sps:$4 sm:$0xff]  }
   0xa   :  { %v1610_v28 = vld [vmem:[%s2038_s1 + $0xcc] ss:$16 sps:$4 sm:$0xff]   ;;  %v1616_v29 = vld [vmem:[%s2038_s1 + $0xe0] ss:$16 sps:$4 sm:$0xff]   ;;  %v1623_v30 = vld [vmem:[%s2038_s1 + $0xc8] ss:$16 sps:$4 sm:$0xff]  }
   0xb   :  { %224 = vmatpush1.bf16.msra.mxu0 %v1490_v8  ;;  %265 = vmatpush1.bf16.msra.mxu1 %v1532_v15  ;;  %v1629_v31 = vld [vmem:[%s2038_s1 + $0xec] ss:$16 sps:$4 sm:$0xff]   ;;  %v1636_v32 = vld [vmem:[%s2038_s1 + $0xe8] ss:$16 sps:$4 sm:$0xff]   ;;  %v52_v34 = vld [vmem:[%s2039_s0] sm:$0xff] }
   0xc   :  { %225 = vmatprep.subr.bf16.mxu0 %v1497_v9  ;;  %266 = vmatprep.subr.bf16.mxu1 %v1538_v16  ;;  %v54_v35 = vunpack.c.l.bf16 %v52_v34  ;;  %v55_v36 = vunpack.c.h.bf16 %v52_v34  ;;  %v53_v38 = vld [vmem:[%s2039_s0 + $0x8] sm:$0xff] }
   0xd   :  { %v57_v45 = vunpack.c.h.bf16 %v53_v38  ;;  %v56_v51 = vunpack.c.l.bf16 %v53_v38 }
   0xf   :  { %226 = vmatpush1.bf16.msra.mxu0 %v1515_v12  ;;  %267 = vmatpush1.bf16.msra.mxu1 %v1556_v19 }
  0x10   :  { %227 = vmatprep.subr.bf16.mxu0 %v1520_v13  ;;  %268 = vmatprep.subr.bf16.mxu1 %v1562_v20 }
  0x13   :  { %228 = vmatpush1.bf16.msra.mxu0 %v1544_v17  ;;  %269 = vmatpush1.bf16.msra.mxu1 %v1580_v23 }
  0x14   :  { %229 = vmatprep.subr.bf16.mxu0 %v1550_v18  ;;  %270 = vmatprep.subr.bf16.mxu1 %v1586_v24 }
  0x17   :  { %230 = vmatpush1.bf16.msra.mxu0 %v1568_v21  ;;  %271 = vmatpush1.bf16.msra.mxu1 %v1604_v27 }
  0x18   :  { %231 = vmatprep.subr.bf16.mxu0 %v1573_v22  ;;  %272 = vmatprep.subr.bf16.mxu1 %v1610_v28 }
  0x1b   :  { %232 = vmatpush1.bf16.msra.mxu0 %v1592_v25  ;;  %273 = vmatpush1.bf16.msra.mxu1 %v1623_v30 }
  0x1c   :  { %233 = vmatprep.subr.bf16.mxu0 %v1598_v26  ;;  %274 = vmatprep.subr.bf16.mxu1 %v1629_v31 }
  0x1f   :  { %234 = vmatpush1.bf16.msra.mxu0 %v1616_v29  ;;  %275 = vmatpush1.bf16.msra.mxu1 %v1636_v32 }
  0x20   :  { %337 = vmatprep.subr.bf16.mxu0 %v1449_v0  ;;  %378 = vmatprep.subr.bf16.mxu1 %v1479_v6 }
  0x22   :  { %252 = vmatmul.mubr.bf16.vlgmr.msra.gmra.mrb[0].mxu0 %v1430_v33  ;;  %293 = vmatmul.mubr.bf16.vlgmr.msra.gmra.mrb[0].mxu1 %v1430_v33 }
  0x23   :  { %338 = vmatpush1.bf16.msra.mxu0 %v1456_v2  ;;  %369 = vmatprep.mubr.bf16.mxu0 %v1429_v1 }
  0x24   :  { %339 = vmatprep.subr.bf16.mxu0 %v1462_v3  ;;  %379 = vmatpush1.bf16.msra.mxu1 %v1484_v7 }
  0x25   :  { %380 = vmatprep.subr.bf16.mxu1 %v1503_v10  ;;  %410 = vmatprep.mubr.bf16.mxu1 %v1429_v1 }
  0x27   :  { %340 = vmatpush1.bf16.msra.mxu0 %v1468_v4 }
  0x28   :  { %341 = vmatprep.subr.bf16.mxu0 %v1474_v5  ;;  %381 = vmatpush1.bf16.msra.mxu1 %v1508_v11 }
  0x29   :  { %382 = vmatprep.subr.bf16.mxu1 %v1525_v14 }
  0x2b   :  { %342 = vmatpush1.bf16.msra.mxu0 %v1490_v8 }
  0x2c   :  { %343 = vmatprep.subr.bf16.mxu0 %v1497_v9  ;;  %383 = vmatpush1.bf16.msra.mxu1 %v1532_v15 }
  0x2d   :  { %384 = vmatprep.subr.bf16.mxu1 %v1538_v16 }
  0x2f   :  { %344 = vmatpush1.bf16.msra.mxu0 %v1515_v12 }
  0x30   :  { %345 = vmatprep.subr.bf16.mxu0 %v1520_v13  ;;  %385 = vmatpush1.bf16.msra.mxu1 %v1556_v19 }
  0x31   :  { %386 = vmatprep.subr.bf16.mxu1 %v1562_v20 }
  0x33   :  { %346 = vmatpush1.bf16.msra.mxu0 %v1544_v17 }
  0x34   :  { %347 = vmatprep.subr.bf16.mxu0 %v1550_v18  ;;  %387 = vmatpush1.bf16.msra.mxu1 %v1580_v23 }
  0x35   :  { %388 = vmatprep.subr.bf16.mxu1 %v1586_v24 }
  0x37   :  { %348 = vmatpush1.bf16.msra.mxu0 %v1568_v21 }
  0x38   :  { %349 = vmatprep.subr.bf16.mxu0 %v1573_v22  ;;  %389 = vmatpush1.bf16.msra.mxu1 %v1604_v27 }
  0x39   :  { %390 = vmatprep.subr.bf16.mxu1 %v1610_v28 }
  0x3b   :  { %350 = vmatpush1.bf16.msra.mxu0 %v1592_v25 }
  0x3c   :  { %351 = vmatprep.subr.bf16.mxu0 %v1598_v26  ;;  %391 = vmatpush1.bf16.msra.mxu1 %v1623_v30 }
  0x3d   :  { %392 = vmatprep.subr.bf16.mxu1 %v1629_v31 }
  0x3f   :  { %352 = vmatpush1.bf16.msra.mxu0 %v1616_v29 }
  0x40   :  { %455 = vmatprep.subr.bf16.mxu0 %v1449_v0  ;;  %393 = vmatpush1.bf16.msra.mxu1 %v1636_v32 }
  0x41   :  { %496 = vmatprep.subr.bf16.mxu1 %v1479_v6 }
  0xf5   :  { %v253_v37 = vpop.f32.mrb[0].mxu0  ;;  %v294_v47 = vpop.f32.mrb[0].mxu1 }
  0xf6   :  { %v301_v39 = vadd.f32 %v253_v37, %v54_v35  ;;  %v255_v40 = vpop.f32.mrb[1].mxu0  ;;  %v296_v48 = vpop.f32.mrb[1].mxu1  ;;  %v303_v54 = vadd.f32 %v294_v47, %v56_v51 }
  0xf7   :  { %v302_v41 = vadd.f32 %v255_v40, %v55_v36  ;;  %v257_v42 = vpop.f32.mrb[2].mxu0  ;;  %v304_v49 = vadd.f32 %v296_v48, %v57_v45  ;;  %v298_v50 = vpop.f32.mrb[2].mxu1  ;;  %v331_v40 = vld [vmem:[%s2039_s0 + $0x10] sm:$0xff] }
  0xf8   :  { %v1195_v43 = vmul.f32 -1.442695, %v301_v39  ;;  %v258_v44 = vpop.f32.mrb[3].mxu0  ;;  %v299_v52 = vpop.f32.mrb[3].mxu1  ;;  %v334_v42 = vunpack.c.h.bf16 %v331_v40 }
  0xf9   :  { %v1196_v46 = vmul.f32 -1.442695, %v302_v41  ;;  %v1197_v53 = vmul.f32 -1.442695, %v304_v49  ;;  %v333_v41 = vunpack.c.l.bf16 %v331_v40 }
  0xfa   :  { %1269 = vpow2.f32 %v1195_v43 }
  0xfb   :  { %1271 = vpow2.f32 %v1196_v46  ;;  %v332_v46 = vld [vmem:[%s2039_s0 + $0x18] sm:$0xff] }
  0xfc   :  { %1273 = vpow2.f32 %v1197_v53 }
  0xfd   :  { %1275 = vtanh.f32 %v303_v54 }
 0x104   :  { %v1270_v55 = vpop.eup %1269 }
 0x105   :  { %v1272_v56 = vpop.eup %1271  ;;  %v308_v57 = vadd.f32 1.0, %v1270_v55 }
 0x106   :  { %v314_v58 = vadd.f32 1.0, %v1272_v56  ;;  %v1274_v59 = vpop.eup %1273  ;;  %v336_v56 = vunpack.c.h.bf16 %v332_v46 }
 0x107   :  { %1277 = vrcp.f32 %v308_v57  ;;  %v1276_v60 = vpop.eup %1275  ;;  %v321_v62 = vadd.f32 1.0, %v1274_v59 }
 0x108   :  { %1279 = vrcp.f32 %v314_v58  ;;  %v335_v58 = vunpack.c.l.bf16 %v332_v46 }
 0x109   :  { %1281 = vrcp.f32 %v321_v62 }
 0x111   :  { %v1278_v61 = vpop.eup %1277 }
 0x112   :  { %v1280_v63 = vpop.eup %1279  ;;  %v325_v33 = vmul.f32 %v1278_v61, %v1276_v60 }
 0x113   :  { %v324_v34 = vmul.f32 0.0, %v1280_v63  ;;  %v1282_v36 = vpop.eup %1281 }
 0x115   :  { %v1682_v35 = vadd.f32 %v325_v33, %v324_v34 }
 0x117   :  { %1283 = vtanh.f32 %v1682_v35 }
 0x121   :  { %v1284_v37 = vpop.eup %1283 }
 0x122   :  { %v328_v38 = vmul.f32 %v1284_v37, %v1282_v36 }
 0x124   :  { %v329_v39 = vpack.c.bf16 %v328_v38, %v328_v38 }
 0x126   :  { %330 = vst [vmem:[%s2040_s2] sm:$0xf] %v329_v39  ;;  %370 = vmatmul.mubr.bf16.vlgmr.msra.gmra.mrb[4].mxu0 %v329_v39  ;;  %411 = vmatmul.mubr.bf16.vlgmr.msra.gmra.mrb[4].mxu1 %v329_v39 }
 0x127   :  { %456 = vmatpush1.bf16.msra.mxu0 %v1456_v2  ;;  %497 = vmatpush1.bf16.msra.mxu1 %v1484_v7 }
 0x128   :  { %457 = vmatprep.subr.bf16.mxu0 %v1462_v3  ;;  %498 = vmatprep.subr.bf16.mxu1 %v1503_v10 }
 0x129   :  { %487 = vmatprep.mubr.bf16.mxu0 %v1429_v1  ;;  %528 = vmatprep.mubr.bf16.mxu1 %v1429_v1 }
 0x12b   :  { %458 = vmatpush1.bf16.msra.mxu0 %v1468_v4  ;;  %499 = vmatpush1.bf16.msra.mxu1 %v1508_v11 }
 0x12c   :  { %459 = vmatprep.subr.bf16.mxu0 %v1474_v5  ;;  %500 = vmatprep.subr.bf16.mxu1 %v1525_v14 }
 0x12f   :  { %460 = vmatpush1.bf16.msra.mxu0 %v1490_v8  ;;  %501 = vmatpush1.bf16.msra.mxu1 %v1532_v15 }
 0x130   :  { %461 = vmatprep.subr.bf16.mxu0 %v1497_v9  ;;  %502 = vmatprep.subr.bf16.mxu1 %v1538_v16 }
 0x133   :  { %462 = vmatpush1.bf16.msra.mxu0 %v1515_v12  ;;  %503 = vmatpush1.bf16.msra.mxu1 %v1556_v19 }
 0x134   :  { %463 = vmatprep.subr.bf16.mxu0 %v1520_v13  ;;  %504 = vmatprep.subr.bf16.mxu1 %v1562_v20 }
 0x137   :  { %464 = vmatpush1.bf16.msra.mxu0 %v1544_v17  ;;  %505 = vmatpush1.bf16.msra.mxu1 %v1580_v23 }
 0x138   :  { %465 = vmatprep.subr.bf16.mxu0 %v1550_v18  ;;  %506 = vmatprep.subr.bf16.mxu1 %v1586_v24 }
 0x13b   :  { %466 = vmatpush1.bf16.msra.mxu0 %v1568_v21  ;;  %507 = vmatpush1.bf16.msra.mxu1 %v1604_v27 }
 0x13c   :  { %467 = vmatprep.subr.bf16.mxu0 %v1573_v22  ;;  %508 = vmatprep.subr.bf16.mxu1 %v1610_v28 }
 0x13f   :  { %468 = vmatpush1.bf16.msra.mxu0 %v1592_v25  ;;  %509 = vmatpush1.bf16.msra.mxu1 %v1623_v30 }
 0x140   :  { %469 = vmatprep.subr.bf16.mxu0 %v1598_v26  ;;  %510 = vmatprep.subr.bf16.mxu1 %v1629_v31 }
 0x143   :  { %470 = vmatpush1.bf16.msra.mxu0 %v1616_v29  ;;  %511 = vmatpush1.bf16.msra.mxu1 %v1636_v32 }
 0x144   :  { %573 = vmatprep.subr.bf16.mxu0 %v1449_v0  ;;  %614 = vmatprep.subr.bf16.mxu1 %v1479_v6 }
 0x1f9   :  { %v371_v43 = vpop.f32.mrb[4].mxu0  ;;  %v412_v44 = vpop.f32.mrb[4].mxu1 }
 0x1fa   :  { %v419_v45 = vadd.f32 %v371_v43, %v333_v41  ;;  %v373_v47 = vpop.f32.mrb[5].mxu0  ;;  %v414_v48 = vpop.f32.mrb[5].mxu1  ;;  %v421_v60 = vadd.f32 %v412_v44, %v335_v58 }
 0x1fb   :  { %v420_v49 = vadd.f32 %v373_v47, %v334_v42  ;;  %v375_v50 = vpop.f32.mrb[6].mxu0  ;;  %v416_v51 = vpop.f32.mrb[6].mxu1  ;;  %v422_v57 = vadd.f32 %v414_v48, %v336_v56 }
 0x1fc   :  { %v1198_v52 = vmul.f32 -1.442695, %v419_v45  ;;  %v376_v53 = vpop.f32.mrb[7].mxu0  ;;  %v417_v54 = vpop.f32.mrb[7].mxu1 }
 0x1fd   :  { %v1199_v55 = vmul.f32 -1.442695, %v420_v49  ;;  %v1200_v59 = vmul.f32 -1.442695, %v422_v57 }
 0x1fe   :  { %1285 = vpow2.f32 %v1198_v52  ;;  %v450_v52 = vld [vmem:[%s2039_s0 + $0x28] sm:$0xff] }
 0x1ff   :  { %1287 = vpow2.f32 %v1199_v55 }
 0x200   :  { %1289 = vpow2.f32 %v1200_v59 }
 0x201   :  { %1291 = vtanh.f32 %v421_v60 }
 0x208   :  { %v1286_v61 = vpop.eup %1285 }
 0x209   :  { %v1288_v62 = vpop.eup %1287  ;;  %v426_v63 = vadd.f32 1.0, %v1286_v61 }
 0x20a   :  { %v432_v33 = vadd.f32 1.0, %v1288_v62  ;;  %v1290_v34 = vpop.eup %1289  ;;  %v454_v62 = vunpack.c.h.bf16 %v450_v52 }
 0x20b   :  { %1293 = vrcp.f32 %v426_v63  ;;  %v1292_v36 = vpop.eup %1291  ;;  %v439_v40 = vadd.f32 1.0, %v1290_v34 }
 0x20c   :  { %1295 = vrcp.f32 %v432_v33  ;;  %v453_v33 = vunpack.c.l.bf16 %v450_v52 }
 0x20d   :  { %1297 = vrcp.f32 %v439_v40 }
 0x215   :  { %v1294_v37 = vpop.eup %1293 }
 0x216   :  { %v1296_v38 = vpop.eup %1295  ;;  %v443_v39 = vmul.f32 %v1294_v37, %v1292_v36 }
 0x217   :  { %v442_v41 = vmul.f32 %v1296_v38, %v1682_v35  ;;  %v1298_v43 = vpop.eup %1297  ;;  %v449_v35 = vld [vmem:[%s2039_s0 + $0x20] sm:$0xff] }
 0x218   :  { %v451_v47 = vunpack.c.l.bf16 %v449_v35  ;;  %v452_v48 = vunpack.c.h.bf16 %v449_v35 }
 0x219   :  { %v1729_v42 = vadd.f32 %v443_v39, %v442_v41 }
 0x21b   :  { %1299 = vtanh.f32 %v1729_v42 }
 0x225   :  { %v1300_v44 = vpop.eup %1299 }
 0x226   :  { %v446_v45 = vmul.f32 %v1300_v44, %v1298_v43 }
 0x228   :  { %v447_v46 = vpack.c.bf16 %v446_v45, %v446_v45 }
 0x22a   :  { %448 = vst [vmem:[%s2040_s2 + $0x4] sm:$0xf] %v447_v46  ;;  %488 = vmatmul.mubr.bf16.vlgmr.msra.gmra.mrb[8].mxu0 %v447_v46  ;;  %529 = vmatmul.mubr.bf16.vlgmr.msra.gmra.mrb[8].mxu1 %v447_v46 }
 0x22b   :  { %574 = vmatpush1.bf16.msra.mxu0 %v1456_v2  ;;  %615 = vmatpush1.bf16.msra.mxu1 %v1484_v7 }
 0x22c   :  { %575 = vmatprep.subr.bf16.mxu0 %v1462_v3  ;;  %616 = vmatprep.subr.bf16.mxu1 %v1503_v10 }
 0x22d   :  { %605 = vmatprep.mubr.bf16.mxu0 %v1429_v1  ;;  %646 = vmatprep.mubr.bf16.mxu1 %v1429_v1 }
 0x22f   :  { %576 = vmatpush1.bf16.msra.mxu0 %v1468_v4  ;;  %617 = vmatpush1.bf16.msra.mxu1 %v1508_v11 }
 0x230   :  { %577 = vmatprep.subr.bf16.mxu0 %v1474_v5  ;;  %618 = vmatprep.subr.bf16.mxu1 %v1525_v14 }
 0x233   :  { %578 = vmatpush1.bf16.msra.mxu0 %v1490_v8  ;;  %619 = vmatpush1.bf16.msra.mxu1 %v1532_v15 }
 0x234   :  { %579 = vmatprep.subr.bf16.mxu0 %v1497_v9  ;;  %620 = vmatprep.subr.bf16.mxu1 %v1538_v16 }
 0x237   :  { %580 = vmatpush1.bf16.msra.mxu0 %v1515_v12  ;;  %621 = vmatpush1.bf16.msra.mxu1 %v1556_v19 }
 0x238   :  { %581 = vmatprep.subr.bf16.mxu0 %v1520_v13  ;;  %622 = vmatprep.subr.bf16.mxu1 %v1562_v20 }
 0x23b   :  { %582 = vmatpush1.bf16.msra.mxu0 %v1544_v17  ;;  %623 = vmatpush1.bf16.msra.mxu1 %v1580_v23 }
 0x23c   :  { %583 = vmatprep.subr.bf16.mxu0 %v1550_v18  ;;  %624 = vmatprep.subr.bf16.mxu1 %v1586_v24 }
 0x23f   :  { %584 = vmatpush1.bf16.msra.mxu0 %v1568_v21  ;;  %625 = vmatpush1.bf16.msra.mxu1 %v1604_v27 }
 0x240   :  { %585 = vmatprep.subr.bf16.mxu0 %v1573_v22  ;;  %626 = vmatprep.subr.bf16.mxu1 %v1610_v28 }
 0x243   :  { %586 = vmatpush1.bf16.msra.mxu0 %v1592_v25  ;;  %627 = vmatpush1.bf16.msra.mxu1 %v1623_v30 }
 0x244   :  { %587 = vmatprep.subr.bf16.mxu0 %v1598_v26  ;;  %628 = vmatprep.subr.bf16.mxu1 %v1629_v31 }
 0x247   :  { %588 = vmatpush1.bf16.msra.mxu0 %v1616_v29  ;;  %629 = vmatpush1.bf16.msra.mxu1 %v1636_v32 }
 0x248   :  { %691 = vmatprep.subr.bf16.mxu0 %v1449_v0  ;;  %732 = vmatprep.subr.bf16.mxu1 %v1479_v6 }
 0x2fd   :  { %v489_v49 = vpop.f32.mrb[8].mxu0  ;;  %v530_v50 = vpop.f32.mrb[8].mxu1 }
 0x2fe   :  { %v537_v51 = vadd.f32 %v489_v49, %v451_v47  ;;  %v491_v53 = vpop.f32.mrb[9].mxu0  ;;  %v532_v54 = vpop.f32.mrb[9].mxu1  ;;  %v539_v36 = vadd.f32 %v530_v50, %v453_v33 }
 0x2ff   :  { %v538_v55 = vadd.f32 %v491_v53, %v452_v48  ;;  %v493_v56 = vpop.f32.mrb[10].mxu0  ;;  %v534_v57 = vpop.f32.mrb[10].mxu1  ;;  %v540_v63 = vadd.f32 %v532_v54, %v454_v62 }
 0x300   :  { %v1201_v58 = vmul.f32 -1.442695, %v537_v51  ;;  %v494_v59 = vpop.f32.mrb[11].mxu0  ;;  %v535_v60 = vpop.f32.mrb[11].mxu1 }
 0x301   :  { %v1202_v61 = vmul.f32 -1.442695, %v538_v55  ;;  %v1203_v34 = vmul.f32 -1.442695, %v540_v63 }
 0x302   :  { %1301 = vpow2.f32 %v1201_v58  ;;  %v568_v58 = vld [vmem:[%s2039_s0 + $0x38] sm:$0xff] }
 0x303   :  { %1303 = vpow2.f32 %v1202_v61 }
 0x304   :  { %1305 = vpow2.f32 %v1203_v34 }
 0x305   :  { %1307 = vtanh.f32 %v539_v36 }
 0x30c   :  { %v1302_v37 = vpop.eup %1301 }
 0x30d   :  { %v1304_v38 = vpop.eup %1303  ;;  %v544_v39 = vadd.f32 1.0, %v1302_v37 }
 0x30e   :  { %v550_v40 = vadd.f32 1.0, %v1304_v38  ;;  %v1306_v41 = vpop.eup %1305  ;;  %v572_v38 = vunpack.c.h.bf16 %v568_v58 }
 0x30f   :  { %1309 = vrcp.f32 %v544_v39  ;;  %v1308_v43 = vpop.eup %1307  ;;  %v557_v35 = vadd.f32 1.0, %v1306_v41 }
 0x310   :  { %1311 = vrcp.f32 %v550_v40  ;;  %v571_v40 = vunpack.c.l.bf16 %v568_v58 }
 0x311   :  { %1313 = vrcp.f32 %v557_v35 }
 0x319   :  { %v1310_v44 = vpop.eup %1309 }
 0x31a   :  { %v1312_v45 = vpop.eup %1311  ;;  %v561_v46 = vmul.f32 %v1310_v44, %v1308_v43 }
 0x31b   :  { %v560_v47 = vmul.f32 %v1312_v45, %v1729_v42  ;;  %v1314_v49 = vpop.eup %1313  ;;  %v567_v42 = vld [vmem:[%s2039_s0 + $0x30] sm:$0xff] }
 0x31c   :  { %v569_v53 = vunpack.c.l.bf16 %v567_v42  ;;  %v570_v54 = vunpack.c.h.bf16 %v567_v42 }
 0x31d   :  { %v1776_v48 = vadd.f32 %v561_v46, %v560_v47 }
 0x31f   :  { %1315 = vtanh.f32 %v1776_v48 }
 0x329   :  { %v1316_v50 = vpop.eup %1315 }
 0x32a   :  { %v564_v51 = vmul.f32 %v1316_v50, %v1314_v49 }
 0x32c   :  { %v565_v52 = vpack.c.bf16 %v564_v51, %v564_v51 }
 0x32e   :  { %566 = vst [vmem:[%s2040_s2 + $0x8] sm:$0xf] %v565_v52  ;;  %606 = vmatmul.mubr.bf16.vlgmr.msra.gmra.mrb[12].mxu0 %v565_v52  ;;  %647 = vmatmul.mubr.bf16.vlgmr.msra.gmra.mrb[12].mxu1 %v565_v52 }
 0x32f   :  { %692 = vmatpush1.bf16.msra.mxu0 %v1456_v2  ;;  %733 = vmatpush1.bf16.msra.mxu1 %v1484_v7 }
 0x330   :  { %693 = vmatprep.subr.bf16.mxu0 %v1462_v3  ;;  %734 = vmatprep.subr.bf16.mxu1 %v1503_v10 }
 0x331   :  { %723 = vmatprep.mubr.bf16.mxu0 %v1429_v1  ;;  %764 = vmatprep.mubr.bf16.mxu1 %v1429_v1 }
 0x333   :  { %694 = vmatpush1.bf16.msra.mxu0 %v1468_v4  ;;  %735 = vmatpush1.bf16.msra.mxu1 %v1508_v11 }
 0x334   :  { %695 = vmatprep.subr.bf16.mxu0 %v1474_v5  ;;  %736 = vmatprep.subr.bf16.mxu1 %v1525_v14 }
 0x337   :  { %696 = vmatpush1.bf16.msra.mxu0 %v1490_v8  ;;  %737 = vmatpush1.bf16.msra.mxu1 %v1532_v15 }
 0x338   :  { %697 = vmatprep.subr.bf16.mxu0 %v1497_v9  ;;  %738 = vmatprep.subr.bf16.mxu1 %v1538_v16 }
 0x33b   :  { %698 = vmatpush1.bf16.msra.mxu0 %v1515_v12  ;;  %739 = vmatpush1.bf16.msra.mxu1 %v1556_v19 }
 0x33c   :  { %699 = vmatprep.subr.bf16.mxu0 %v1520_v13  ;;  %740 = vmatprep.subr.bf16.mxu1 %v1562_v20 }
 0x33f   :  { %700 = vmatpush1.bf16.msra.mxu0 %v1544_v17  ;;  %741 = vmatpush1.bf16.msra.mxu1 %v1580_v23 }
 0x340   :  { %701 = vmatprep.subr.bf16.mxu0 %v1550_v18  ;;  %742 = vmatprep.subr.bf16.mxu1 %v1586_v24 }
 0x343   :  { %702 = vmatpush1.bf16.msra.mxu0 %v1568_v21  ;;  %743 = vmatpush1.bf16.msra.mxu1 %v1604_v27 }
 0x344   :  { %703 = vmatprep.subr.bf16.mxu0 %v1573_v22  ;;  %744 = vmatprep.subr.bf16.mxu1 %v1610_v28 }
 0x347   :  { %704 = vmatpush1.bf16.msra.mxu0 %v1592_v25  ;;  %745 = vmatpush1.bf16.msra.mxu1 %v1623_v30 }
 0x348   :  { %705 = vmatprep.subr.bf16.mxu0 %v1598_v26  ;;  %746 = vmatprep.subr.bf16.mxu1 %v1629_v31 }
 0x34b   :  { %706 = vmatpush1.bf16.msra.mxu0 %v1616_v29  ;;  %747 = vmatpush1.bf16.msra.mxu1 %v1636_v32 }
 0x34c   :  { %809 = vmatprep.subr.bf16.mxu0 %v1449_v0  ;;  %850 = vmatprep.subr.bf16.mxu1 %v1479_v6 }
 0x401   :  { %v607_v55 = vpop.f32.mrb[12].mxu0  ;;  %v648_v56 = vpop.f32.mrb[12].mxu1 }
 0x402   :  { %v655_v57 = vadd.f32 %v607_v55, %v569_v53  ;;  %v609_v59 = vpop.f32.mrb[13].mxu0  ;;  %v650_v60 = vpop.f32.mrb[13].mxu1  ;;  %v657_v43 = vadd.f32 %v648_v56, %v571_v40 }
 0x403   :  { %v656_v61 = vadd.f32 %v609_v59, %v570_v54  ;;  %v611_v62 = vpop.f32.mrb[14].mxu0  ;;  %v652_v63 = vpop.f32.mrb[14].mxu1  ;;  %v658_v39 = vadd.f32 %v650_v60, %v572_v38 }
 0x404   :  { %v1204_v33 = vmul.f32 -1.442695, %v655_v57  ;;  %v612_v34 = vpop.f32.mrb[15].mxu0  ;;  %v653_v36 = vpop.f32.mrb[15].mxu1 }
 0x405   :  { %v1205_v37 = vmul.f32 -1.442695, %v656_v61  ;;  %v1206_v41 = vmul.f32 -1.442695, %v658_v39 }
 0x406   :  { %1317 = vpow2.f32 %v1204_v33  ;;  %v686_v33 = vld [vmem:[%s2039_s0 + $0x48] sm:$0xff] }
 0x407   :  { %1319 = vpow2.f32 %v1205_v37 }
 0x408   :  { %1321 = vpow2.f32 %v1206_v41 }
 0x409   :  { %1323 = vtanh.f32 %v657_v43  ;;  %v690_v43 = vunpack.c.h.bf16 %v686_v33 }
 0x410   :  { %v1318_v44 = vpop.eup %1317 }
 0x411   :  { %v1320_v45 = vpop.eup %1319  ;;  %v662_v46 = vadd.f32 1.0, %v1318_v44 }
 0x412   :  { %v668_v35 = vadd.f32 1.0, %v1320_v45  ;;  %v1322_v47 = vpop.eup %1321  ;;  %v689_v45 = vunpack.c.l.bf16 %v686_v33 }
 0x413   :  { %1325 = vrcp.f32 %v662_v46  ;;  %v1324_v49 = vpop.eup %1323  ;;  %v675_v42 = vadd.f32 1.0, %v1322_v47 }
 0x414   :  { %1327 = vrcp.f32 %v668_v35 }
 0x415   :  { %1329 = vrcp.f32 %v675_v42 }
 0x41d   :  { %v1326_v50 = vpop.eup %1325 }
 0x41e   :  { %v1328_v51 = vpop.eup %1327  ;;  %v679_v52 = vmul.f32 %v1326_v50, %v1324_v49 }
 0x41f   :  { %v678_v53 = vmul.f32 %v1328_v51, %v1776_v48  ;;  %v1330_v55 = vpop.eup %1329  ;;  %v685_v48 = vld [vmem:[%s2039_s0 + $0x40] sm:$0xff] }
 0x420   :  { %v687_v59 = vunpack.c.l.bf16 %v685_v48  ;;  %v688_v60 = vunpack.c.h.bf16 %v685_v48 }
 0x421   :  { %v1823_v54 = vadd.f32 %v679_v52, %v678_v53 }
 0x423   :  { %1331 = vtanh.f32 %v1823_v54 }
 0x42d   :  { %v1332_v56 = vpop.eup %1331 }
 0x42e   :  { %v682_v57 = vmul.f32 %v1332_v56, %v1330_v55 }
 0x430   :  { %v683_v58 = vpack.c.bf16 %v682_v57, %v682_v57 }
 0x432   :  { %684 = vst [vmem:[%s2040_s2 + $0xc] sm:$0xf] %v683_v58  ;;  %724 = vmatmul.mubr.bf16.vlgmr.msra.gmra.mrb[16].mxu0 %v683_v58  ;;  %765 = vmatmul.mubr.bf16.vlgmr.msra.gmra.mrb[16].mxu1 %v683_v58 }
 0x433   :  { %810 = vmatpush1.bf16.msra.mxu0 %v1456_v2  ;;  %851 = vmatpush1.bf16.msra.mxu1 %v1484_v7 }
 0x434   :  { %811 = vmatprep.subr.bf16.mxu0 %v1462_v3  ;;  %852 = vmatprep.subr.bf16.mxu1 %v1503_v10 }
 0x435   :  { %841 = vmatprep.mubr.bf16.mxu0 %v1429_v1  ;;  %882 = vmatprep.mubr.bf16.mxu1 %v1429_v1 }
 0x437   :  { %812 = vmatpush1.bf16.msra.mxu0 %v1468_v4  ;;  %853 = vmatpush1.bf16.msra.mxu1 %v1508_v11 }
 0x438   :  { %813 = vmatprep.subr.bf16.mxu0 %v1474_v5  ;;  %854 = vmatprep.subr.bf16.mxu1 %v1525_v14 }
 0x43b   :  { %814 = vmatpush1.bf16.msra.mxu0 %v1490_v8  ;;  %855 = vmatpush1.bf16.msra.mxu1 %v1532_v15 }
 0x43c   :  { %815 = vmatprep.subr.bf16.mxu0 %v1497_v9  ;;  %856 = vmatprep.subr.bf16.mxu1 %v1538_v16 }
 0x43f   :  { %816 = vmatpush1.bf16.msra.mxu0 %v1515_v12  ;;  %857 = vmatpush1.bf16.msra.mxu1 %v1556_v19 }
 0x440   :  { %817 = vmatprep.subr.bf16.mxu0 %v1520_v13  ;;  %858 = vmatprep.subr.bf16.mxu1 %v1562_v20 }
 0x443   :  { %818 = vmatpush1.bf16.msra.mxu0 %v1544_v17  ;;  %859 = vmatpush1.bf16.msra.mxu1 %v1580_v23 }
 0x444   :  { %819 = vmatprep.subr.bf16.mxu0 %v1550_v18  ;;  %860 = vmatprep.subr.bf16.mxu1 %v1586_v24 }
 0x447   :  { %820 = vmatpush1.bf16.msra.mxu0 %v1568_v21  ;;  %861 = vmatpush1.bf16.msra.mxu1 %v1604_v27 }
 0x448   :  { %821 = vmatprep.subr.bf16.mxu0 %v1573_v22  ;;  %862 = vmatprep.subr.bf16.mxu1 %v1610_v28 }
 0x44b   :  { %822 = vmatpush1.bf16.msra.mxu0 %v1592_v25  ;;  %863 = vmatpush1.bf16.msra.mxu1 %v1623_v30 }
 0x44c   :  { %823 = vmatprep.subr.bf16.mxu0 %v1598_v26  ;;  %864 = vmatprep.subr.bf16.mxu1 %v1629_v31 }
 0x44f   :  { %824 = vmatpush1.bf16.msra.mxu0 %v1616_v29  ;;  %865 = vmatpush1.bf16.msra.mxu1 %v1636_v32 }
 0x450   :  { %927 = vmatprep.subr.bf16.mxu0 %v1449_v0  ;;  %968 = vmatprep.subr.bf16.mxu1 %v1479_v6 }
 0x505   :  { %v725_v61 = vpop.f32.mrb[16].mxu0  ;;  %v766_v62 = vpop.f32.mrb[16].mxu1 }
 0x506   :  { %v773_v63 = vadd.f32 %v725_v61, %v687_v59  ;;  %v727_v34 = vpop.f32.mrb[17].mxu0  ;;  %v768_v36 = vpop.f32.mrb[17].mxu1  ;;  %v775_v35 = vadd.f32 %v766_v62, %v689_v45  ;;  %v1404_v45 = vld [vmem:[%s2038_s1 + $0x28] ss:$16 sps:$4 sm:$0xff]  }
 0x507   :  { %v774_v37 = vadd.f32 %v727_v34, %v688_v60  ;;  %v729_v38 = vpop.f32.mrb[18].mxu0  ;;  %v770_v0 = vpop.f32.mrb[18].mxu1  ;;  %v776_v44 = vadd.f32 %v768_v36, %v690_v43  ;;  %v1402_v43 = vld [vmem:[%s2038_s1 + $0x2c] ss:$16 sps:$4 sm:$0xff]  }
 0x508   :  { %v1207_v39 = vmul.f32 -1.442695, %v773_v63  ;;  %v730_v6 = vpop.f32.mrb[19].mxu0  ;;  %v771_v40 = vpop.f32.mrb[19].mxu1 }
 0x509   :  { %v1208_v41 = vmul.f32 -1.442695, %v774_v37  ;;  %v1209_v46 = vmul.f32 -1.442695, %v776_v44  ;;  %v1399_v6 = vld [vmem:[%s2038_s1] ss:$16 sps:$4 sm:$0xff]  }
 0x50a   :  { %1333 = vpow2.f32 %v1207_v39  ;;  %v1400_v40 = vld [vmem:[%s2038_s1 + $0x8] ss:$16 sps:$4 sm:$0xff]   ;;  %v1403_v44 = vld [vmem:[%s2038_s1 + $0x20] ss:$16 sps:$4 sm:$0xff]  }
 0x50b   :  { %1335 = vpow2.f32 %v1208_v41  ;;  %v1401_v41 = vld [vmem:[%s2038_s1 + $0x24] ss:$16 sps:$4 sm:$0xff]  }
 0x50c   :  { %1337 = vpow2.f32 %v1209_v46  ;;  %v1405_v46 = vld [vmem:[%s2038_s1 + $0x44] ss:$16 sps:$4 sm:$0xff]  }
 0x50d   :  { %1339 = vtanh.f32 %v775_v35  ;;  %v1406_v35 = vld [vmem:[%s2038_s1 + $0x4c] ss:$16 sps:$4 sm:$0xff]  }
 0x514   :  { %v1334_v47 = vpop.eup %1333 }
 0x515   :  { %v1336_v49 = vpop.eup %1335  ;;  %v780_v50 = vadd.f32 1.0, %v1334_v47  ;;  %v1408_v47 = vld [vmem:[%s2038_s1 + $0x48] ss:$16 sps:$4 sm:$0xff]  }
 0x516   :  { %v786_v51 = vadd.f32 1.0, %v1336_v49  ;;  %v1338_v52 = vpop.eup %1337  ;;  %v1409_v49 = vld [vmem:[%s2038_s1 + $0x64] ss:$16 sps:$4 sm:$0xff]  }
 0x517   :  { %1341 = vrcp.f32 %v780_v50  ;;  %v1340_v42 = vpop.eup %1339  ;;  %v793_v57 = vadd.f32 1.0, %v1338_v52  ;;  %v1410_v50 = vld [vmem:[%s2038_s1 + $0x6c] ss:$16 sps:$4 sm:$0xff]   ;;  %v1412_v52 = vld [vmem:[%s2038_s1 + $0x68] ss:$16 sps:$4 sm:$0xff]  }
 0x518   :  { %1343 = vrcp.f32 %v786_v51  ;;  %v1411_v51 = vld [vmem:[%s2038_s1 + $0x60] ss:$16 sps:$4 sm:$0xff]  }
 0x519   :  { %1345 = vrcp.f32 %v793_v57  ;;  %v1417_v57 = vld [vmem:[%s2038_s1 + $0xa4] ss:$16 sps:$4 sm:$0xff]  }
 0x521   :  { %v1342_v53 = vpop.eup %1341 }
 0x522   :  { %v1344_v55 = vpop.eup %1343  ;;  %v797_v56 = vmul.f32 %v1342_v53, %v1340_v42  ;;  %v1413_v42 = vld [vmem:[%s2038_s1 + $0x84] ss:$16 sps:$4 sm:$0xff]   ;;  %v1414_v53 = vld [vmem:[%s2038_s1 + $0x8c] ss:$16 sps:$4 sm:$0xff]  }
 0x523   :  { %v796_v58 = vmul.f32 %v1344_v55, %v1823_v54  ;;  %v1346_v59 = vpop.eup %1345  ;;  %v1415_v55 = vld [vmem:[%s2038_s1 + $0x80] ss:$16 sps:$4 sm:$0xff]  }
 0x525   :  { %v1870_v48 = vadd.f32 %v797_v56, %v796_v58  ;;  %v1416_v56 = vld [vmem:[%s2038_s1 + $0x88] ss:$16 sps:$4 sm:$0xff]   ;;  %v1418_v58 = vld [vmem:[%s2038_s1 + $0xac] ss:$16 sps:$4 sm:$0xff]  }
 0x527   :  { %1347 = vtanh.f32 %v1870_v48 }
 0x531   :  { %v1348_v60 = vpop.eup %1347 }
 0x532   :  { %v800_v61 = vmul.f32 %v1348_v60, %v1346_v59  ;;  %v1420_v59 = vld [vmem:[%s2038_s1 + $0xa8] ss:$16 sps:$4 sm:$0xff]   ;;  %v1421_v60 = vld [vmem:[%s2038_s1 + $0xc4] ss:$16 sps:$4 sm:$0xff]  }
 0x534   :  { %v801_v62 = vpack.c.bf16 %v800_v61, %v800_v61  ;;  %v1422_v61 = vld [vmem:[%s2038_s1 + $0xcc] ss:$16 sps:$4 sm:$0xff]  }
 0x536   :  { %802 = vst [vmem:[%s2040_s2 + $0x10] sm:$0xf] %v801_v62  ;;  %842 = vmatmul.mubr.bf16.vlgmr.msra.gmra.mrb[20].mxu0 %v801_v62  ;;  %883 = vmatmul.mubr.bf16.vlgmr.msra.gmra.mrb[20].mxu1 %v801_v62  ;;  %v1423_v62 = vld [vmem:[%s2038_s1 + $0xc0] ss:$16 sps:$4 sm:$0xff]  }
 0x537   :  { %928 = vmatpush1.bf16.msra.mxu0 %v1456_v2  ;;  %969 = vmatpush1.bf16.msra.mxu1 %v1484_v7  ;;  %v1397_v2 = vld [vmem:[%s2038_s1 + $0x4] ss:$16 sps:$4 sm:$0xff]  }
 0x538   :  { %929 = vmatprep.subr.bf16.mxu0 %v1462_v3  ;;  %970 = vmatprep.subr.bf16.mxu1 %v1503_v10  ;;  %v1398_v3 = vld [vmem:[%s2038_s1 + $0xc] ss:$16 sps:$4 sm:$0xff]  }
 0x539   :  { %959 = vmatprep.mubr.bf16.mxu0 %v1429_v1  ;;  %1000 = vmatprep.mubr.bf16.mxu1 %v1429_v1 }
 0x53b   :  { %930 = vmatpush1.bf16.msra.mxu0 %v1468_v4  ;;  %971 = vmatpush1.bf16.msra.mxu1 %v1508_v11  ;;  %v803_v4 = vld [vmem:[%s2039_s0 + $0x50] sm:$0xff]  ;;  %v804_v11 = vld [vmem:[%s2039_s0 + $0x58] sm:$0xff] }
 0x53c   :  { %931 = vmatprep.subr.bf16.mxu0 %v1474_v5  ;;  %972 = vmatprep.subr.bf16.mxu1 %v1525_v14  ;;  %v805_v5 = vunpack.c.l.bf16 %v803_v4  ;;  %v806_v7 = vunpack.c.h.bf16 %v803_v4  ;;  %v1426_v4 = vld [vmem:[%s2038_s1 + $0xec] ss:$16 sps:$4 sm:$0xff]  }
 0x53f   :  { %932 = vmatpush1.bf16.msra.mxu0 %v1490_v8  ;;  %973 = vmatpush1.bf16.msra.mxu1 %v1532_v15 }
 0x540   :  { %933 = vmatprep.subr.bf16.mxu0 %v1497_v9  ;;  %974 = vmatprep.subr.bf16.mxu1 %v1538_v16 }
 0x543   :  { %934 = vmatpush1.bf16.msra.mxu0 %v1515_v12  ;;  %975 = vmatpush1.bf16.msra.mxu1 %v1556_v19 }
 0x544   :  { %935 = vmatprep.subr.bf16.mxu0 %v1520_v13  ;;  %976 = vmatprep.subr.bf16.mxu1 %v1562_v20 }
 0x547   :  { %936 = vmatpush1.bf16.msra.mxu0 %v1544_v17  ;;  %977 = vmatpush1.bf16.msra.mxu1 %v1580_v23  ;;  %v807_v23 = vunpack.c.l.bf16 %v804_v11 }
 0x548   :  { %937 = vmatprep.subr.bf16.mxu0 %v1550_v18  ;;  %978 = vmatprep.subr.bf16.mxu1 %v1586_v24 }
 0x54b   :  { %938 = vmatpush1.bf16.msra.mxu0 %v1568_v21  ;;  %979 = vmatpush1.bf16.msra.mxu1 %v1604_v27  ;;  %v808_v21 = vunpack.c.h.bf16 %v804_v11 }
 0x54c   :  { %939 = vmatprep.subr.bf16.mxu0 %v1573_v22  ;;  %980 = vmatprep.subr.bf16.mxu1 %v1610_v28 }
 0x54f   :  { %940 = vmatpush1.bf16.msra.mxu0 %v1592_v25  ;;  %981 = vmatpush1.bf16.msra.mxu1 %v1623_v30 }
 0x550   :  { %941 = vmatprep.subr.bf16.mxu0 %v1598_v26  ;;  %982 = vmatprep.subr.bf16.mxu1 %v1629_v31 }
 0x553   :  { %942 = vmatpush1.bf16.msra.mxu0 %v1616_v29  ;;  %983 = vmatpush1.bf16.msra.mxu1 %v1636_v32 }
 0x554   :  { %1045 = vmatprep.subr.bf16.mxu0 %v1397_v2  ;;  %1086 = vmatprep.subr.bf16.mxu1 %v1398_v3  ;;  %v1424_v2 = vld [vmem:[%s2038_s1 + $0xc8] ss:$16 sps:$4 sm:$0xff]   ;;  %v1425_v3 = vld [vmem:[%s2038_s1 + $0xe4] ss:$16 sps:$4 sm:$0xff]  }
 0x609   :  { %v843_v8 = vpop.f32.mrb[20].mxu0  ;;  %v884_v9 = vpop.f32.mrb[20].mxu1 }
 0x60a   :  { %v891_v10 = vadd.f32 %v843_v8, %v805_v5  ;;  %v845_v12 = vpop.f32.mrb[21].mxu0  ;;  %v886_v13 = vpop.f32.mrb[21].mxu1  ;;  %v893_v25 = vadd.f32 %v884_v9, %v807_v23  ;;  %v1427_v5 = vld [vmem:[%s2038_s1 + $0xe0] ss:$16 sps:$4 sm:$0xff]  }
 0x60b   :  { %v892_v14 = vadd.f32 %v845_v12, %v806_v7  ;;  %v847_v15 = vpop.f32.mrb[22].mxu0  ;;  %v888_v16 = vpop.f32.mrb[22].mxu1  ;;  %v894_v22 = vadd.f32 %v886_v13, %v808_v21  ;;  %v1428_v7 = vld [vmem:[%s2038_s1 + $0xe8] ss:$16 sps:$4 sm:$0xff]   ;;  %v921_v8 = vld [vmem:[%s2039_s0 + $0x60] sm:$0xff] }
 0x60c   :  { %v1210_v17 = vmul.f32 -1.442695, %v891_v10  ;;  %v848_v18 = vpop.f32.mrb[23].mxu0  ;;  %v889_v19 = vpop.f32.mrb[23].mxu1  ;;  %v923_v9 = vunpack.c.l.bf16 %v921_v8  ;;  %v924_v10 = vunpack.c.h.bf16 %v921_v8 }
 0x60d   :  { %v1211_v20 = vmul.f32 -1.442695, %v892_v14  ;;  %v1212_v24 = vmul.f32 -1.442695, %v894_v22  ;;  %v922_v14 = vld [vmem:[%s2039_s0 + $0x68] sm:$0xff] }
 0x60e   :  { %1349 = vpow2.f32 %v1210_v17 }
 0x60f   :  { %1351 = vpow2.f32 %v1211_v20 }
 0x610   :  { %1353 = vpow2.f32 %v1212_v24  ;;  %v926_v24 = vunpack.c.h.bf16 %v922_v14 }
 0x611   :  { %1355 = vtanh.f32 %v893_v25 }
 0x618   :  { %v1350_v26 = vpop.eup %1349 }
 0x619   :  { %v1352_v27 = vpop.eup %1351  ;;  %v898_v28 = vadd.f32 1.0, %v1350_v26  ;;  %v925_v26 = vunpack.c.l.bf16 %v922_v14 }
 0x61a   :  { %v904_v29 = vadd.f32 1.0, %v1352_v27  ;;  %v1354_v30 = vpop.eup %1353 }
 0x61b   :  { %1357 = vrcp.f32 %v898_v28  ;;  %v1356_v31 = vpop.eup %1355  ;;  %v911_v33 = vadd.f32 1.0, %v1354_v30 }
 0x61c   :  { %1359 = vrcp.f32 %v904_v29 }
 0x61d   :  { %1361 = vrcp.f32 %v911_v33 }
 0x625   :  { %v1358_v32 = vpop.eup %1357 }
 0x626   :  { %v1360_v54 = vpop.eup %1359  ;;  %v915_v63 = vmul.f32 %v1358_v32, %v1356_v31 }
 0x627   :  { %v914_v34 = vmul.f32 %v1360_v54, %v1870_v48  ;;  %v1362_v37 = vpop.eup %1361  ;;  %v1419_v48 = vld [vmem:[%s2038_s1 + $0xa0] ss:$16 sps:$4 sm:$0xff]  }
 0x629   :  { %v1921_v36 = vadd.f32 %v915_v63, %v914_v34 }
 0x62b   :  { %1363 = vtanh.f32 %v1921_v36 }
 0x635   :  { %v1364_v38 = vpop.eup %1363 }
 0x636   :  { %v918_v0 = vmul.f32 %v1364_v38, %v1362_v37 }
 0x638   :  { %v919_v39 = vpack.c.bf16 %v918_v0, %v918_v0 }
 0x63a   :  { %920 = vst [vmem:[%s2040_s2 + $0x14] sm:$0xf] %v919_v39  ;;  %960 = vmatmul.mubr.bf16.vlgmr.msra.gmra.mrb[24].mxu0 %v919_v39  ;;  %1001 = vmatmul.mubr.bf16.vlgmr.msra.gmra.mrb[24].mxu1 %v919_v39 }
 0x63b   :  { %1046 = vmatpush1.bf16.msra.mxu0 %v1399_v6  ;;  %1087 = vmatpush1.bf16.msra.mxu1 %v1400_v40 }
 0x63c   :  { %1047 = vmatprep.subr.bf16.mxu0 %v1401_v41  ;;  %1088 = vmatprep.subr.bf16.mxu1 %v1402_v43 }
 0x63d   :  { %1077 = vmatprep.mubr.bf16.mxu0 %v1429_v1  ;;  %1118 = vmatprep.mubr.bf16.mxu1 %v1429_v1  ;;  %v1407_v1 = vld [vmem:[%s2038_s1 + $0x40] ss:$16 sps:$4 sm:$0xff]  }
 0x63f   :  { %1048 = vmatpush1.bf16.msra.mxu0 %v1403_v44  ;;  %1089 = vmatpush1.bf16.msra.mxu1 %v1404_v45  ;;  %v1039_v44 = vld [vmem:[%s2039_s0 + $0x70] sm:$0xff] }
 0x640   :  { %1049 = vmatprep.subr.bf16.mxu0 %v1405_v46  ;;  %1090 = vmatprep.subr.bf16.mxu1 %v1406_v35  ;;  %v1041_v45 = vunpack.c.l.bf16 %v1039_v44  ;;  %v1042_v46 = vunpack.c.h.bf16 %v1039_v44 }
 0x643   :  { %1050 = vmatpush1.bf16.msra.mxu0 %v1407_v1  ;;  %1091 = vmatpush1.bf16.msra.mxu1 %v1408_v47  ;;  %v1040_v47 = vld [vmem:[%s2039_s0 + $0x78] sm:$0xff] }
 0x644   :  { %1051 = vmatprep.subr.bf16.mxu0 %v1409_v49  ;;  %1092 = vmatprep.subr.bf16.mxu1 %v1410_v50 }
 0x647   :  { %1052 = vmatpush1.bf16.msra.mxu0 %v1411_v51  ;;  %1093 = vmatpush1.bf16.msra.mxu1 %v1412_v52 }
 0x648   :  { %1053 = vmatprep.subr.bf16.mxu0 %v1413_v42  ;;  %1094 = vmatprep.subr.bf16.mxu1 %v1414_v53 }
 0x64b   :  { %1054 = vmatpush1.bf16.msra.mxu0 %v1415_v55  ;;  %1095 = vmatpush1.bf16.msra.mxu1 %v1416_v56 }
 0x64c   :  { %1055 = vmatprep.subr.bf16.mxu0 %v1417_v57  ;;  %1096 = vmatprep.subr.bf16.mxu1 %v1418_v58  ;;  %v1044_v58 = vunpack.c.h.bf16 %v1040_v47 }
 0x64f   :  { %1056 = vmatpush1.bf16.msra.mxu0 %v1419_v48  ;;  %1097 = vmatpush1.bf16.msra.mxu1 %v1420_v59  ;;  %v1043_v59 = vunpack.c.l.bf16 %v1040_v47 }
 0x650   :  { %1057 = vmatprep.subr.bf16.mxu0 %v1421_v60  ;;  %1098 = vmatprep.subr.bf16.mxu1 %v1422_v61 }
 0x653   :  { %1058 = vmatpush1.bf16.msra.mxu0 %v1423_v62  ;;  %1099 = vmatpush1.bf16.msra.mxu1 %v1424_v2 }
 0x654   :  { %1059 = vmatprep.subr.bf16.mxu0 %v1425_v3  ;;  %1100 = vmatprep.subr.bf16.mxu1 %v1426_v4 }
 0x657   :  { %1060 = vmatpush1.bf16.msra.mxu0 %v1427_v5  ;;  %1101 = vmatpush1.bf16.msra.mxu1 %v1428_v7 }
 0x70d   :  { %v961_v11 = vpop.f32.mrb[24].mxu0  ;;  %v1002_v12 = vpop.f32.mrb[24].mxu1 }
 0x70e   :  { %v1009_v13 = vadd.f32 %v961_v11, %v923_v9  ;;  %v963_v15 = vpop.f32.mrb[25].mxu0  ;;  %v1004_v16 = vpop.f32.mrb[25].mxu1  ;;  %v1011_v28 = vadd.f32 %v1002_v12, %v925_v26 }
 0x70f   :  { %v1010_v17 = vadd.f32 %v963_v15, %v924_v10  ;;  %v965_v18 = vpop.f32.mrb[26].mxu0  ;;  %v1006_v19 = vpop.f32.mrb[26].mxu1  ;;  %v1012_v25 = vadd.f32 %v1004_v16, %v926_v24 }
 0x710   :  { %v1213_v20 = vmul.f32 -1.442695, %v1009_v13  ;;  %v966_v21 = vpop.f32.mrb[27].mxu0  ;;  %v1007_v22 = vpop.f32.mrb[27].mxu1 }
 0x711   :  { %v1214_v23 = vmul.f32 -1.442695, %v1010_v17  ;;  %v1215_v27 = vmul.f32 -1.442695, %v1012_v25 }
 0x712   :  { %1365 = vpow2.f32 %v1213_v20 }
 0x713   :  { %1367 = vpow2.f32 %v1214_v23 }
 0x714   :  { %1369 = vpow2.f32 %v1215_v27 }
 0x715   :  { %1371 = vtanh.f32 %v1011_v28 }
 0x71c   :  { %v1366_v29 = vpop.eup %1365 }
 0x71d   :  { %v1368_v30 = vpop.eup %1367  ;;  %v1016_v31 = vadd.f32 1.0, %v1366_v29 }
 0x71e   :  { %v1022_v32 = vadd.f32 1.0, %v1368_v30  ;;  %v1370_v54 = vpop.eup %1369 }
 0x71f   :  { %1373 = vrcp.f32 %v1016_v31  ;;  %v1372_v63 = vpop.eup %1371  ;;  %v1029_v38 = vadd.f32 1.0, %v1370_v54 }
 0x720   :  { %1375 = vrcp.f32 %v1022_v32 }
 0x721   :  { %1377 = vrcp.f32 %v1029_v38 }
 0x729   :  { %v1374_v33 = vpop.eup %1373 }
 0x72a   :  { %v1376_v34 = vpop.eup %1375  ;;  %v1033_v37 = vmul.f32 %v1374_v33, %v1372_v63 }
 0x72b   :  { %v1032_v0 = vmul.f32 %v1376_v34, %v1921_v36  ;;  %v1378_v6 = vpop.eup %1377 }
 0x72d   :  { %v1034_v39 = vadd.f32 %v1033_v37, %v1032_v0 }
 0x72f   :  { %1379 = vtanh.f32 %v1034_v39 }
 0x739   :  { %v1380_v40 = vpop.eup %1379 }
 0x73a   :  { %v1036_v41 = vmul.f32 %v1380_v40, %v1378_v6 }
 0x73c   :  { %v1037_v43 = vpack.c.bf16 %v1036_v41, %v1036_v41 }
 0x73e   :  { %1038 = vst [vmem:[%s2040_s2 + $0x18] sm:$0xf] %v1037_v43  ;;  %1078 = vmatmul.mubr.bf16.vlgmr.msra.gmra.mrb[28].mxu0 %v1037_v43  ;;  %1119 = vmatmul.mubr.bf16.vlgmr.msra.gmra.mrb[28].mxu1 %v1037_v43 }
 0x811   :  { %v1079_v36 = vpop.f32.mrb[28].mxu0  ;;  %v1120_v35 = vpop.f32.mrb[28].mxu1 }
 0x812   :  { %v1127_v1 = vadd.f32 %v1079_v36, %v1041_v45  ;;  %v1081_v49 = vpop.f32.mrb[29].mxu0  ;;  %v1122_v50 = vpop.f32.mrb[29].mxu1  ;;  %v1129_v61 = vadd.f32 %v1120_v35, %v1043_v59 }
 0x813   :  { %v1128_v51 = vadd.f32 %v1081_v49, %v1042_v46  ;;  %v1083_v52 = vpop.f32.mrb[30].mxu0  ;;  %v1124_v42 = vpop.f32.mrb[30].mxu1  ;;  %v1130_v48 = vadd.f32 %v1122_v50, %v1044_v58 }
 0x814   :  { %v1216_v53 = vmul.f32 -1.442695, %v1127_v1  ;;  %v1084_v55 = vpop.f32.mrb[31].mxu0  ;;  %v1125_v56 = vpop.f32.mrb[31].mxu1 }
 0x815   :  { %v1217_v57 = vmul.f32 -1.442695, %v1128_v51  ;;  %v1218_v60 = vmul.f32 -1.442695, %v1130_v48 }
 0x816   :  { %1381 = vpow2.f32 %v1216_v53 }
 0x817   :  { %1383 = vpow2.f32 %v1217_v57 }
 0x818   :  { %1385 = vpow2.f32 %v1218_v60 }
 0x819   :  { %1387 = vtanh.f32 %v1129_v61 }
 0x820   :  { %v1382_v62 = vpop.eup %1381 }
 0x821   :  { %v1384_v2 = vpop.eup %1383  ;;  %v1134_v3 = vadd.f32 1.0, %v1382_v62 }
 0x822   :  { %v1140_v4 = vadd.f32 1.0, %v1384_v2  ;;  %v1386_v5 = vpop.eup %1385 }
 0x823   :  { %1389 = vrcp.f32 %v1134_v3  ;;  %v1388_v7 = vpop.eup %1387  ;;  %v1147_v11 = vadd.f32 1.0, %v1386_v5 }
 0x824   :  { %1391 = vrcp.f32 %v1140_v4 }
 0x825   :  { %1393 = vrcp.f32 %v1147_v11 }
 0x82d   :  { %v1390_v8 = vpop.eup %1389 }
 0x82e   :  { %v1392_v9 = vpop.eup %1391  ;;  %v1151_v10 = vmul.f32 %v1390_v8, %v1388_v7 }
 0x82f   :  { %v1150_v12 = vmul.f32 %v1392_v9, %v1034_v39  ;;  %v1394_v14 = vpop.eup %1393 }
 0x831   :  { %v1152_v13 = vadd.f32 %v1151_v10, %v1150_v12 }
 0x833   :  { %1395 = vtanh.f32 %v1152_v13 }
 0x83d   :  { %v1396_v15 = vpop.eup %1395 }
 0x83e   :  { %v1154_v16 = vmul.f32 %v1396_v15, %v1394_v14 }
 0x840   :  { %v1155_v17 = vpack.c.bf16 %v1154_v16, %v1154_v16 }
 0x842   :  { %1156 = vst [vmem:[%s2040_s2 + $0x1c] sm:$0xf] %v1155_v17 }

</bundles_post_ra>
